<compile_context>
chip_gen: v6e
topology: v6e:2x2x1
jax: 0.10.0
libtpu: 0.0.40
codegen_flags: <defaults>
</compile_context>

<pallas_src>
import functools

import jax
import jax.numpy as jnp
from jax.experimental import pallas as pl
from jax.experimental.pallas import tpu as pltpu


def _round_up(x, m):
    return ((x + m - 1) // m) * m


def _node_future_encoder_kernel(
    present_ref,   # (BB, I)        f32
    future_ref,    # (T, BB, D)     bf16, time-major
    wih_ref,       # (D, 8H)        bf16  [fwd | bwd], i/f/o cols pre-scaled by 0.5
    bih_ref,       # (1, 8H)        f32   folded b_ih + b_hh, i/f/o lanes pre-scaled
    whh_f_ref,     # (H, 4H)        bf16  forward hidden->gate weights
    whh_b_ref,     # (H, 4H)        bf16  reverse hidden->gate weights
    winit_ref,     # (I, 2H)        f32   [wh | wc] state initializers
    binit_ref,     # (1, 2H)        f32
    out_ref,       # (BB, 4H)       f32   [h_fwd | h_bwd | c_fwd | c_bwd]
    xg_f_ref,      # scratch (T, BB, 4H) f32 : fwd input->gate pre-activations
    xg_b_ref,      # scratch (T, BB, 4H) f32 : bwd input->gate pre-activations
):
    T, BB, _ = future_ref.shape
    H = whh_f_ref.shape[0]
    G = 4 * H
    unroll = True if T <= 16 else 8   # partial unroll once T grows (spill guard)

    # ---- initial states: one fused f32 matmul for the two Linear initializers
    init = jnp.dot(present_ref[...], winit_ref[...],
                   preferred_element_type=jnp.float32) + binit_ref[...]
    h0_f = init[:, 0:H]
    c0_f = init[:, H:2 * H]
    h0_b = jnp.zeros((BB, H), jnp.float32)   # reverse direction starts from zeros
    c0_b = jnp.zeros((BB, H), jnp.float32)

    # ---- hoisted input->gate projections (prologue, off the recurrence path) -
    wih = wih_ref[...]                        # (D, 8H) bf16, stays resident
    bih = bih_ref[...]                        # (1, 8H) f32

    def proj(t, carry):
        xg = jnp.dot(future_ref[t], wih,
                     preferred_element_type=jnp.float32) + bih    # (BB, 8H) f32
        xg_f_ref[t] = xg[:, 0:G]              # lane-aligned halves (G = 128)
        xg_b_ref[t] = xg[:, G:2 * G]
        return carry

    jax.lax.fori_loop(0, T, proj, 0, unroll=unroll)

    # hidden->gate weights stay vreg-resident (bf16: half the vregs of f32)
    whh_f = whh_f_ref[...]
    whh_b = whh_b_ref[...]

    # gate lane mask: tanh for g, sigmoid-via-tanh fixup elsewhere (i, f, o)
    lane = jax.lax.broadcasted_iota(jnp.int32, (BB, G), 1)
    g_lanes = (lane >= 2 * H) & (lane < 3 * H)

    def gate_update(pre, c):
        # i/f/o pre-activations arrive pre-scaled by 0.5 (weights + bias), so a
        # single whole-vreg tanh gives sigmoid: sigmoid(x) = 0.5*tanh(x/2) + 0.5.
        a = jnp.tanh(pre)                              # one EUP pass per vreg
        act = jnp.where(g_lanes, a, 0.5 * a + 0.5)     # cheap VPU fixup
        i = act[:, 0 * H:1 * H]
        f = act[:, 1 * H:2 * H]
        g = act[:, 2 * H:3 * H]
        o = act[:, 3 * H:4 * H]
        c_new = f * c + i * g
        h_new = o * jnp.tanh(c_new)
        return h_new, c_new

    # ---- fused bidirectional recurrence (independent chains interleaved) -----
    def step(t, carry):
        h_f, c_f, h_b, c_b = carry
        xg_f = xg_f_ref[t]                             # (BB, 4H) half-width load
        xg_b = xg_b_ref[T - 1 - t]
        pre_f = jnp.dot(h_f.astype(jnp.bfloat16), whh_f,
                        preferred_element_type=jnp.float32) + xg_f
        pre_b = jnp.dot(h_b.astype(jnp.bfloat16), whh_b,
                        preferred_element_type=jnp.float32) + xg_b
        h_f, c_f = gate_update(pre_f, c_f)
        h_b, c_b = gate_update(pre_b, c_b)
        return h_f, c_f, h_b, c_b

    h_f, c_f, h_b, c_b = jax.lax.fori_loop(
        0, T, step, (h0_f, c0_f, h0_b, c0_b), unroll=unroll)

    # ---- unpack_rnn_state: single lane-dense (BB, 4H = 128) store ------------
    # NOTE: assumes unpack_RNN_state flattens per row as [h_fwd|h_bwd|c_fwd|c_bwd]
    # (matches the pure-JAX reference below; confirm against the torch source).
    out_ref[...] = jnp.concatenate([h_f, h_b, c_f, c_b], axis=-1)
    # TODO(synk): nn.Dropout is applied in eval mode (identity); training-mode
    # dropout would use pltpu.prng_seed / pltpu.stateful_bernoulli here.


def prepare_params(params):
    """One-time (model-load) parameter transforms for the kernel."""
    H = params["w_hh_f"].shape[1]
    # PyTorch gate order is i, f, g, o.  Scale i/f/o columns (and bias lanes) by
    # 0.5 so the kernel evaluates sigmoid with the same tanh pass used for g.
    gate_scale = jnp.concatenate(
        [jnp.full((H,), 0.5, jnp.float32), jnp.full((H,), 0.5, jnp.float32),
         jnp.ones((H,), jnp.float32), jnp.full((H,), 0.5, jnp.float32)])

    def prep_dir(w_ih, w_hh, b_ih, b_hh):
        wih_t = w_ih.T * gate_scale[None, :]            # (D, 4H)
        whh_t = w_hh.T * gate_scale[None, :]            # (H, 4H)
        b = (b_ih + b_hh) * gate_scale                  # (4H,)
        return wih_t, whh_t, b

    wih_f, whh_f, b_f = prep_dir(params["w_ih_f"], params["w_hh_f"],
                                 params["b_ih_f"], params["b_hh_f"])
    wih_b, whh_b, b_b = prep_dir(params["w_ih_b"], params["w_hh_b"],
                                 params["b_ih_b"], params["b_hh_b"])

    return {
        # bf16 MXU operands (0.5-scaling is exact in bf16); f32 accumulate in-kernel.
        "wih_cat": jnp.concatenate([wih_f, wih_b], axis=1).astype(jnp.bfloat16),  # (D, 8H)
        "b_cat": jnp.concatenate([b_f, b_b])[None, :].astype(jnp.float32),        # (1, 8H)
        "whh_f": whh_f.astype(jnp.bfloat16),                                      # (H, 4H)
        "whh_b": whh_b.astype(jnp.bfloat16),
        "w_init": jnp.concatenate([params["wh"].T, params["wc"].T],
                                  axis=1).astype(jnp.float32),                    # (I, 2H)
        "b_init": jnp.concatenate([params["bh"],
                                   params["bc"]])[None, :].astype(jnp.float32),   # (1, 2H)
    }


@functools.partial(jax.jit, static_argnames=("time_major", "block_b"))
def node_future_encoder(present, future, prep, *, time_major=False, block_b=128):
    """present: (B, I); future: (B, T, D) f32 (or (T, B, D) if time_major) -> (B, 4H) f32."""
    if time_major:
        T, B, D = future.shape
        future_tm = future
    else:
        B, T, D = future.shape
        # TODO(synk): store `future` time-major upstream to skip this transpose dispatch.
        future_tm = jnp.transpose(future, (1, 0, 2))
    future_tm = future_tm.astype(jnp.bfloat16)            # matmul operand only
    present = present.astype(jnp.float32)

    H = prep["whh_f"].shape[0]
    I = present.shape[1]

    # Batch-block the grid (pad B to a sublane multiple).  Stack many nodes /
    # agents along B upstream: >=128 rows fills the MXU M dimension, amortizes
    # the per-call fixed cost, and on v7x the "parallel" axis is split across
    # the two TensorCores while per-block scratch keeps VMEM bounded.
    BB = block_b if B > block_b else _round_up(B, 8)
    B_pad = _round_up(B, BB)
    if B_pad != B:
        present = jnp.pad(present, ((0, B_pad - B), (0, 0)))
        future_tm = jnp.pad(future_tm, ((0, 0), (0, B_pad - B), (0, 0)))

    out = pl.pallas_call(
        _node_future_encoder_kernel,
        out_shape=jax.ShapeDtypeStruct((B_pad, 4 * H), jnp.float32),
        grid_spec=pltpu.PrefetchScalarGridSpec(
            num_scalar_prefetch=0,
            grid=(B_pad // BB,),
            in_specs=[
                pl.BlockSpec((BB, I), lambda i: (i, 0)),            # present
                pl.BlockSpec((T, BB, D), lambda i: (0, i, 0)),      # future (time-major)
                pl.BlockSpec((D, 8 * H), lambda i: (0, 0)),         # weights: same block
                pl.BlockSpec((1, 8 * H), lambda i: (0, 0)),         #   every step -> no
                pl.BlockSpec((H, 4 * H), lambda i: (0, 0)),         #   re-DMA across grid
                pl.BlockSpec((H, 4 * H), lambda i: (0, 0)),
                pl.BlockSpec((I, 2 * H), lambda i: (0, 0)),
                pl.BlockSpec((1, 2 * H), lambda i: (0, 0)),
            ],
            out_specs=pl.BlockSpec((BB, 4 * H), lambda i: (i, 0)),
            scratch_shapes=[
                pltpu.VMEM((T, BB, 4 * H), jnp.float32),            # xg_f (per block)
                pltpu.VMEM((T, BB, 4 * H), jnp.float32),            # xg_b (per block)
            ],
        ),
        compiler_params=pltpu.CompilerParams(
            dimension_semantics=("parallel",)),
    )(
        present, future_tm,
        prep["wih_cat"], prep["b_cat"], prep["whh_f"], prep["whh_b"],
        prep["w_init"], prep["b_init"],
    )
    return out if B_pad == B else out[:B]


def init_params(key, input_dim, hidden_dim, initializer_input_size):
    """Deterministic synthetic parameters matching the PyTorch module's shapes."""
    ks = jax.random.split(key, 12)
    s = 0.1
    H, D, I = hidden_dim, input_dim, initializer_input_size
    return {
        # bidirectional LSTM, layer 0
        "w_ih_f": s * jax.random.normal(ks[0], (4 * H, D), jnp.float32),
        "w_hh_f": s * jax.random.normal(ks[1], (4 * H, H), jnp.float32),
        "b_ih_f": s * jax.random.normal(ks[2], (4 * H,), jnp.float32),
        "b_hh_f": s * jax.random.normal(ks[3], (4 * H,), jnp.float32),
        "w_ih_b": s * jax.random.normal(ks[4], (4 * H, D), jnp.float32),
        "w_hh_b": s * jax.random.normal(ks[5], (4 * H, H), jnp.float32),
        "b_ih_b": s * jax.random.normal(ks[6], (4 * H,), jnp.float32),
        "b_hh_b": s * jax.random.normal(ks[7], (4 * H,), jnp.float32),
        # state_initializers: Linear(I, H) for 'h' and 'c'
        "wh": s * jax.random.normal(ks[8], (H, I), jnp.float32),
        "bh": s * jax.random.normal(ks[9], (H,), jnp.float32),
        "wc": s * jax.random.normal(ks[10], (H, I), jnp.float32),
        "bc": s * jax.random.normal(ks[11], (H,), jnp.float32),
    }


def _reference(present, future, params):
    """Pure-JAX reference mirroring the PyTorch forward (eval mode), f32 HIGHEST."""
    hp = jax.lax.Precision.HIGHEST
    B, T, D = future.shape

    def cell(x, h, c, w_ih, w_hh, b_ih, b_hh):
        gates = (jnp.dot(x, w_ih.T, precision=hp)
                 + jnp.dot(h, w_hh.T, precision=hp) + b_ih + b_hh)
        i, f, g, o = jnp.split(gates, 4, axis=-1)
        c = jax.nn.sigmoid(f) * c + jax.nn.sigmoid(i) * jnp.tanh(g)
        h = jax.nn.sigmoid(o) * jnp.tanh(c)
        return h, c

    h_f = jnp.dot(present, params["wh"].T, precision=hp) + params["bh"]
    c_f = jnp.dot(present, params["wc"].T, precision=hp) + params["bc"]
    for t in range(T):
        h_f, c_f = cell(future[:, t], h_f, c_f, params["w_ih_f"], params["w_hh_f"],
                        params["b_ih_f"], params["b_hh_f"])

    h_b = jnp.zeros_like(h_f)
    c_b = jnp.zeros_like(c_f)
    for t in range(T - 1, -1, -1):
        h_b, c_b = cell(future[:, t], h_b, c_b, params["w_ih_b"], params["w_hh_b"],
                        params["b_ih_b"], params["b_hh_b"])

    return jnp.concatenate([h_f, h_b, c_f, c_b], axis=-1)


if __name__ == "__main__":
    input_dim = 6                  # future trajectory feature dim
    hidden_dim = 32                # LSTM hidden size
    initializer_input_size = 32    # 'present' encoding size
    B, T = 8, 8

    key = jax.random.PRNGKey(0)
    k_par, k_pres, k_fut = jax.random.split(key, 3)

    params = init_params(k_par, input_dim, hidden_dim, initializer_input_size)
    prep = prepare_params(params)      # one-time (model-load) transform
    present = jax.random.normal(k_pres, (B, initializer_input_size), jnp.float32)
    future = jax.random.normal(k_fut, (B, T, input_dim), jnp.float32)

    out = node_future_encoder(present, future, prep)
    out = jax.block_until_ready(out)

    assert out.shape == (B, 4 * hidden_dim), out.shape
    assert bool(jnp.all(jnp.isfinite(out)))

    ref = jax.block_until_ready(_reference(present, future, params))
    # bf16 MXU operands (f32 accumulate) introduce a small, documented recurrence
    # drift vs the f32 HIGHEST-precision reference; tolerance reflects that.
    err = float(jnp.max(jnp.abs(out - ref)))
    assert jnp.allclose(out, ref, atol=2e-2, rtol=2e-2), err

    print("KERNEL_OK")
</pallas_src>

<mosaic_0001>
module attributes {stable_mosaic.version = 11 : i64} {
  func.func @_node_future_encoder_kernel(%arg0: i32, %arg1: memref<8x32xf32, #tpu.memory_space<vmem>>, %arg2: memref<8x8x6xbf16, #tpu.memory_space<vmem>>, %arg3: memref<6x256xbf16, #tpu.memory_space<vmem>>, %arg4: memref<1x256xf32, #tpu.memory_space<vmem>>, %arg5: memref<32x128xbf16, #tpu.memory_space<vmem>>, %arg6: memref<32x128xbf16, #tpu.memory_space<vmem>>, %arg7: memref<32x64xf32, #tpu.memory_space<vmem>>, %arg8: memref<1x64xf32, #tpu.memory_space<vmem>>, %arg9: memref<8x128xf32, #tpu.memory_space<vmem>>, %arg10: memref<8x8x128xf32, #tpu.memory_space<vmem>>, %arg11: memref<8x8x128xf32, #tpu.memory_space<vmem>>) attributes {dimension_semantics = [#tpu.dimension_semantics<parallel>], iteration_bounds = array<i64: 1>, scalar_prefetch = 0 : i64, scratch_operands = 2 : i64, tpu.core_type = #tpu.core_type<tc>, window_params = [{transform_indices = @transform_0, window_bounds = array<i64: 8, 32>}, {transform_indices = @transform_1, window_bounds = array<i64: 8, 8, 6>}, {pipeline_mode = #tpu.pipeline_mode<synchronous>, transform_indices = @transform_2, window_bounds = array<i64: 6, 256>}, {pipeline_mode = #tpu.pipeline_mode<synchronous>, transform_indices = @transform_3, window_bounds = array<i64: 1, 256>}, {pipeline_mode = #tpu.pipeline_mode<synchronous>, transform_indices = @transform_4, window_bounds = array<i64: 32, 128>}, {pipeline_mode = #tpu.pipeline_mode<synchronous>, transform_indices = @transform_5, window_bounds = array<i64: 32, 128>}, {pipeline_mode = #tpu.pipeline_mode<synchronous>, transform_indices = @transform_6, window_bounds = array<i64: 32, 64>}, {pipeline_mode = #tpu.pipeline_mode<synchronous>, transform_indices = @transform_7, window_bounds = array<i64: 1, 64>}, {transform_indices = @transform_8, window_bounds = array<i64: 8, 128>}]} {
    %c0 = arith.constant 0 : index
    %c0_0 = arith.constant 0 : index
    %0 = vector.load %arg1[%c0, %c0_0] : memref<8x32xf32, #tpu.memory_space<vmem>>, vector<8x32xf32>
    %c0_1 = arith.constant 0 : index
    %c0_2 = arith.constant 0 : index
    %1 = vector.load %arg7[%c0_1, %c0_2] : memref<32x64xf32, #tpu.memory_space<vmem>>, vector<32x64xf32>
    %cst = arith.constant dense<0.000000e+00> : vector<8x64xf32>
    %2 = tpu.matmul %0, %1, %cst {dimension_numbers = #tpu.dot_dimension_numbers<[1], [0], [0], [1], [0, 0, 1, 1], [], []>} : vector<8x32xf32>, vector<32x64xf32>, vector<8x64xf32> -> vector<8x64xf32>
    %c0_3 = arith.constant 0 : index
    %c0_4 = arith.constant 0 : index
    %3 = vector.load %arg8[%c0_3, %c0_4] : memref<1x64xf32, #tpu.memory_space<vmem>>, vector<1x64xf32>
    %4 = vector.broadcast %3 : vector<1x64xf32> to vector<8x64xf32>
    %5 = arith.addf %2, %4 : vector<8x64xf32>
    %6 = vector.extract_strided_slice %5 {offsets = [0, 0], sizes = [8, 32], strides = [1, 1]} : vector<8x64xf32> to vector<8x32xf32>
    %7 = vector.extract_strided_slice %5 {offsets = [0, 32], sizes = [8, 32], strides = [1, 1]} : vector<8x64xf32> to vector<8x32xf32>
    %cst_5 = arith.constant 0.000000e+00 : f32
    %8 = vector.broadcast %cst_5 : f32 to vector<8x32xf32>
    %cst_6 = arith.constant 0.000000e+00 : f32
    %9 = vector.broadcast %cst_6 : f32 to vector<8x32xf32>
    %c0_7 = arith.constant 0 : index
    %c0_8 = arith.constant 0 : index
    %10 = vector.load %arg3[%c0_7, %c0_8] : memref<6x256xbf16, #tpu.memory_space<vmem>>, vector<6x256xbf16>
    %c0_9 = arith.constant 0 : index
    %c0_10 = arith.constant 0 : index
    %11 = vector.load %arg4[%c0_9, %c0_10] : memref<1x256xf32, #tpu.memory_space<vmem>>, vector<1x256xf32>
    %c0_i32 = arith.constant 0 : i32
    %12 = arith.index_cast %c0_i32 : i32 to index
    %c0_11 = arith.constant 0 : index
    %c0_12 = arith.constant 0 : index
    %13 = vector.load %arg2[%12, %c0_11, %c0_12] : memref<8x8x6xbf16, #tpu.memory_space<vmem>>, vector<1x8x6xbf16>
    %14 = vector.shape_cast %13 : vector<1x8x6xbf16> to vector<8x6xbf16>
    %cst_13 = arith.constant dense<0.000000e+00> : vector<8x256xf32>
    %15 = tpu.matmul %14, %10, %cst_13 {dimension_numbers = #tpu.dot_dimension_numbers<[1], [0], [0], [1], [0, 0, 1, 1], [], []>} : vector<8x6xbf16>, vector<6x256xbf16>, vector<8x256xf32> -> vector<8x256xf32>
    %16 = vector.broadcast %11 : vector<1x256xf32> to vector<8x256xf32>
    %17 = arith.addf %15, %16 : vector<8x256xf32>
    %18 = vector.extract_strided_slice %17 {offsets = [0, 0], sizes = [8, 128], strides = [1, 1]} : vector<8x256xf32> to vector<8x128xf32>
    %19 = arith.index_cast %c0_i32 : i32 to index
    %c0_14 = arith.constant 0 : index
    %c0_15 = arith.constant 0 : index
    %20 = vector.load %arg10[%19, %c0_14, %c0_15] : memref<8x8x128xf32, #tpu.memory_space<vmem>>, vector<1x8x128xf32>
    %21 = vector.shape_cast %20 : vector<1x8x128xf32> to vector<8x128xf32>
    %22 = vector.shape_cast %18 : vector<8x128xf32> to vector<1x8x128xf32>
    tpu.vector_store %arg10[%19, %c0_14, %c0_15], %22 {strides = array<i32>} : memref<8x8x128xf32, #tpu.memory_space<vmem>>, vector<1x8x128xf32>,
    %23 = vector.extract_strided_slice %17 {offsets = [0, 128], sizes = [8, 128], strides = [1, 1]} : vector<8x256xf32> to vector<8x128xf32>
    %24 = arith.index_cast %c0_i32 : i32 to index
    %c0_16 = arith.constant 0 : index
    %c0_17 = arith.constant 0 : index
    %25 = vector.load %arg11[%24, %c0_16, %c0_17] : memref<8x8x128xf32, #tpu.memory_space<vmem>>, vector<1x8x128xf32>
    %26 = vector.shape_cast %25 : vector<1x8x128xf32> to vector<8x128xf32>
    %27 = vector.shape_cast %23 : vector<8x128xf32> to vector<1x8x128xf32>
    tpu.vector_store %arg11[%24, %c0_16, %c0_17], %27 {strides = array<i32>} : memref<8x8x128xf32, #tpu.memory_space<vmem>>, vector<1x8x128xf32>,
    %c1_i32 = arith.constant 1 : i32
    %28 = arith.index_cast %c1_i32 : i32 to index
    %c0_18 = arith.constant 0 : index
    %c0_19 = arith.constant 0 : index
    %29 = vector.load %arg2[%28, %c0_18, %c0_19] : memref<8x8x6xbf16, #tpu.memory_space<vmem>>, vector<1x8x6xbf16>
    %30 = vector.shape_cast %29 : vector<1x8x6xbf16> to vector<8x6xbf16>
    %cst_20 = arith.constant dense<0.000000e+00> : vector<8x256xf32>
    %31 = tpu.matmul %30, %10, %cst_20 {dimension_numbers = #tpu.dot_dimension_numbers<[1], [0], [0], [1], [0, 0, 1, 1], [], []>} : vector<8x6xbf16>, vector<6x256xbf16>, vector<8x256xf32> -> vector<8x256xf32>
    %32 = vector.broadcast %11 : vector<1x256xf32> to vector<8x256xf32>
    %33 = arith.addf %31, %32 : vector<8x256xf32>
    %34 = vector.extract_strided_slice %33 {offsets = [0, 0], sizes = [8, 128], strides = [1, 1]} : vector<8x256xf32> to vector<8x128xf32>
    %35 = arith.index_cast %c1_i32 : i32 to index
    %c0_21 = arith.constant 0 : index
    %c0_22 = arith.constant 0 : index
    %36 = vector.load %arg10[%35, %c0_21, %c0_22] : memref<8x8x128xf32, #tpu.memory_space<vmem>>, vector<1x8x128xf32>
    %37 = vector.shape_cast %36 : vector<1x8x128xf32> to vector<8x128xf32>
    %38 = vector.shape_cast %34 : vector<8x128xf32> to vector<1x8x128xf32>
    tpu.vector_store %arg10[%35, %c0_21, %c0_22], %38 {strides = array<i32>} : memref<8x8x128xf32, #tpu.memory_space<vmem>>, vector<1x8x128xf32>,
    %39 = vector.extract_strided_slice %33 {offsets = [0, 128], sizes = [8, 128], strides = [1, 1]} : vector<8x256xf32> to vector<8x128xf32>
    %40 = arith.index_cast %c1_i32 : i32 to index
    %c0_23 = arith.constant 0 : index
    %c0_24 = arith.constant 0 : index
    %41 = vector.load %arg11[%40, %c0_23, %c0_24] : memref<8x8x128xf32, #tpu.memory_space<vmem>>, vector<1x8x128xf32>
    %42 = vector.shape_cast %41 : vector<1x8x128xf32> to vector<8x128xf32>
    %43 = vector.shape_cast %39 : vector<8x128xf32> to vector<1x8x128xf32>
    tpu.vector_store %arg11[%40, %c0_23, %c0_24], %43 {strides = array<i32>} : memref<8x8x128xf32, #tpu.memory_space<vmem>>, vector<1x8x128xf32>,
    %c2_i32 = arith.constant 2 : i32
    %44 = arith.index_cast %c2_i32 : i32 to index
    %c0_25 = arith.constant 0 : index
    %c0_26 = arith.constant 0 : index
    %45 = vector.load %arg2[%44, %c0_25, %c0_26] : memref<8x8x6xbf16, #tpu.memory_space<vmem>>, vector<1x8x6xbf16>
    %46 = vector.shape_cast %45 : vector<1x8x6xbf16> to vector<8x6xbf16>
    %cst_27 = arith.constant dense<0.000000e+00> : vector<8x256xf32>
    %47 = tpu.matmul %46, %10, %cst_27 {dimension_numbers = #tpu.dot_dimension_numbers<[1], [0], [0], [1], [0, 0, 1, 1], [], []>} : vector<8x6xbf16>, vector<6x256xbf16>, vector<8x256xf32> -> vector<8x256xf32>
    %48 = vector.broadcast %11 : vector<1x256xf32> to vector<8x256xf32>
    %49 = arith.addf %47, %48 : vector<8x256xf32>
    %50 = vector.extract_strided_slice %49 {offsets = [0, 0], sizes = [8, 128], strides = [1, 1]} : vector<8x256xf32> to vector<8x128xf32>
    %51 = arith.index_cast %c2_i32 : i32 to index
    %c0_28 = arith.constant 0 : index
    %c0_29 = arith.constant 0 : index
    %52 = vector.load %arg10[%51, %c0_28, %c0_29] : memref<8x8x128xf32, #tpu.memory_space<vmem>>, vector<1x8x128xf32>
    %53 = vector.shape_cast %52 : vector<1x8x128xf32> to vector<8x128xf32>
    %54 = vector.shape_cast %50 : vector<8x128xf32> to vector<1x8x128xf32>
    tpu.vector_store %arg10[%51, %c0_28, %c0_29], %54 {strides = array<i32>} : memref<8x8x128xf32, #tpu.memory_space<vmem>>, vector<1x8x128xf32>,
    %55 = vector.extract_strided_slice %49 {offsets = [0, 128], sizes = [8, 128], strides = [1, 1]} : vector<8x256xf32> to vector<8x128xf32>
    %56 = arith.index_cast %c2_i32 : i32 to index
    %c0_30 = arith.constant 0 : index
    %c0_31 = arith.constant 0 : index
    %57 = vector.load %arg11[%56, %c0_30, %c0_31] : memref<8x8x128xf32, #tpu.memory_space<vmem>>, vector<1x8x128xf32>
    %58 = vector.shape_cast %57 : vector<1x8x128xf32> to vector<8x128xf32>
    %59 = vector.shape_cast %55 : vector<8x128xf32> to vector<1x8x128xf32>
    tpu.vector_store %arg11[%56, %c0_30, %c0_31], %59 {strides = array<i32>} : memref<8x8x128xf32, #tpu.memory_space<vmem>>, vector<1x8x128xf32>,
    %c3_i32 = arith.constant 3 : i32
    %60 = arith.index_cast %c3_i32 : i32 to index
    %c0_32 = arith.constant 0 : index
    %c0_33 = arith.constant 0 : index
    %61 = vector.load %arg2[%60, %c0_32, %c0_33] : memref<8x8x6xbf16, #tpu.memory_space<vmem>>, vector<1x8x6xbf16>
    %62 = vector.shape_cast %61 : vector<1x8x6xbf16> to vector<8x6xbf16>
    %cst_34 = arith.constant dense<0.000000e+00> : vector<8x256xf32>
    %63 = tpu.matmul %62, %10, %cst_34 {dimension_numbers = #tpu.dot_dimension_numbers<[1], [0], [0], [1], [0, 0, 1, 1], [], []>} : vector<8x6xbf16>, vector<6x256xbf16>, vector<8x256xf32> -> vector<8x256xf32>
    %64 = vector.broadcast %11 : vector<1x256xf32> to vector<8x256xf32>
    %65 = arith.addf %63, %64 : vector<8x256xf32>
    %66 = vector.extract_strided_slice %65 {offsets = [0, 0], sizes = [8, 128], strides = [1, 1]} : vector<8x256xf32> to vector<8x128xf32>
    %67 = arith.index_cast %c3_i32 : i32 to index
    %c0_35 = arith.constant 0 : index
    %c0_36 = arith.constant 0 : index
    %68 = vector.load %arg10[%67, %c0_35, %c0_36] : memref<8x8x128xf32, #tpu.memory_space<vmem>>, vector<1x8x128xf32>
    %69 = vector.shape_cast %68 : vector<1x8x128xf32> to vector<8x128xf32>
    %70 = vector.shape_cast %66 : vector<8x128xf32> to vector<1x8x128xf32>
    tpu.vector_store %arg10[%67, %c0_35, %c0_36], %70 {strides = array<i32>} : memref<8x8x128xf32, #tpu.memory_space<vmem>>, vector<1x8x128xf32>,
    %71 = vector.extract_strided_slice %65 {offsets = [0, 128], sizes = [8, 128], strides = [1, 1]} : vector<8x256xf32> to vector<8x128xf32>
    %72 = arith.index_cast %c3_i32 : i32 to index
    %c0_37 = arith.constant 0 : index
    %c0_38 = arith.constant 0 : index
    %73 = vector.load %arg11[%72, %c0_37, %c0_38] : memref<8x8x128xf32, #tpu.memory_space<vmem>>, vector<1x8x128xf32>
    %74 = vector.shape_cast %73 : vector<1x8x128xf32> to vector<8x128xf32>
    %75 = vector.shape_cast %71 : vector<8x128xf32> to vector<1x8x128xf32>
    tpu.vector_store %arg11[%72, %c0_37, %c0_38], %75 {strides = array<i32>} : memref<8x8x128xf32, #tpu.memory_space<vmem>>, vector<1x8x128xf32>,
    %c4_i32 = arith.constant 4 : i32
    %76 = arith.index_cast %c4_i32 : i32 to index
    %c0_39 = arith.constant 0 : index
    %c0_40 = arith.constant 0 : index
    %77 = vector.load %arg2[%76, %c0_39, %c0_40] : memref<8x8x6xbf16, #tpu.memory_space<vmem>>, vector<1x8x6xbf16>
    %78 = vector.shape_cast %77 : vector<1x8x6xbf16> to vector<8x6xbf16>
    %cst_41 = arith.constant dense<0.000000e+00> : vector<8x256xf32>
    %79 = tpu.matmul %78, %10, %cst_41 {dimension_numbers = #tpu.dot_dimension_numbers<[1], [0], [0], [1], [0, 0, 1, 1], [], []>} : vector<8x6xbf16>, vector<6x256xbf16>, vector<8x256xf32> -> vector<8x256xf32>
    %80 = vector.broadcast %11 : vector<1x256xf32> to vector<8x256xf32>
    %81 = arith.addf %79, %80 : vector<8x256xf32>
    %82 = vector.extract_strided_slice %81 {offsets = [0, 0], sizes = [8, 128], strides = [1, 1]} : vector<8x256xf32> to vector<8x128xf32>
    %83 = arith.index_cast %c4_i32 : i32 to index
    %c0_42 = arith.constant 0 : index
    %c0_43 = arith.constant 0 : index
    %84 = vector.load %arg10[%83, %c0_42, %c0_43] : memref<8x8x128xf32, #tpu.memory_space<vmem>>, vector<1x8x128xf32>
    %85 = vector.shape_cast %84 : vector<1x8x128xf32> to vector<8x128xf32>
    %86 = vector.shape_cast %82 : vector<8x128xf32> to vector<1x8x128xf32>
    tpu.vector_store %arg10[%83, %c0_42, %c0_43], %86 {strides = array<i32>} : memref<8x8x128xf32, #tpu.memory_space<vmem>>, vector<1x8x128xf32>,
    %87 = vector.extract_strided_slice %81 {offsets = [0, 128], sizes = [8, 128], strides = [1, 1]} : vector<8x256xf32> to vector<8x128xf32>
    %88 = arith.index_cast %c4_i32 : i32 to index
    %c0_44 = arith.constant 0 : index
    %c0_45 = arith.constant 0 : index
    %89 = vector.load %arg11[%88, %c0_44, %c0_45] : memref<8x8x128xf32, #tpu.memory_space<vmem>>, vector<1x8x128xf32>
    %90 = vector.shape_cast %89 : vector<1x8x128xf32> to vector<8x128xf32>
    %91 = vector.shape_cast %87 : vector<8x128xf32> to vector<1x8x128xf32>
    tpu.vector_store %arg11[%88, %c0_44, %c0_45], %91 {strides = array<i32>} : memref<8x8x128xf32, #tpu.memory_space<vmem>>, vector<1x8x128xf32>,
    %c5_i32 = arith.constant 5 : i32
    %92 = arith.index_cast %c5_i32 : i32 to index
    %c0_46 = arith.constant 0 : index
    %c0_47 = arith.constant 0 : index
    %93 = vector.load %arg2[%92, %c0_46, %c0_47] : memref<8x8x6xbf16, #tpu.memory_space<vmem>>, vector<1x8x6xbf16>
    %94 = vector.shape_cast %93 : vector<1x8x6xbf16> to vector<8x6xbf16>
    %cst_48 = arith.constant dense<0.000000e+00> : vector<8x256xf32>
    %95 = tpu.matmul %94, %10, %cst_48 {dimension_numbers = #tpu.dot_dimension_numbers<[1], [0], [0], [1], [0, 0, 1, 1], [], []>} : vector<8x6xbf16>, vector<6x256xbf16>, vector<8x256xf32> -> vector<8x256xf32>
    %96 = vector.broadcast %11 : vector<1x256xf32> to vector<8x256xf32>
    %97 = arith.addf %95, %96 : vector<8x256xf32>
    %98 = vector.extract_strided_slice %97 {offsets = [0, 0], sizes = [8, 128], strides = [1, 1]} : vector<8x256xf32> to vector<8x128xf32>
    %99 = arith.index_cast %c5_i32 : i32 to index
    %c0_49 = arith.constant 0 : index
    %c0_50 = arith.constant 0 : index
    %100 = vector.load %arg10[%99, %c0_49, %c0_50] : memref<8x8x128xf32, #tpu.memory_space<vmem>>, vector<1x8x128xf32>
    %101 = vector.shape_cast %100 : vector<1x8x128xf32> to vector<8x128xf32>
    %102 = vector.shape_cast %98 : vector<8x128xf32> to vector<1x8x128xf32>
    tpu.vector_store %arg10[%99, %c0_49, %c0_50], %102 {strides = array<i32>} : memref<8x8x128xf32, #tpu.memory_space<vmem>>, vector<1x8x128xf32>,
    %103 = vector.extract_strided_slice %97 {offsets = [0, 128], sizes = [8, 128], strides = [1, 1]} : vector<8x256xf32> to vector<8x128xf32>
    %104 = arith.index_cast %c5_i32 : i32 to index
    %c0_51 = arith.constant 0 : index
    %c0_52 = arith.constant 0 : index
    %105 = vector.load %arg11[%104, %c0_51, %c0_52] : memref<8x8x128xf32, #tpu.memory_space<vmem>>, vector<1x8x128xf32>
    %106 = vector.shape_cast %105 : vector<1x8x128xf32> to vector<8x128xf32>
    %107 = vector.shape_cast %103 : vector<8x128xf32> to vector<1x8x128xf32>
    tpu.vector_store %arg11[%104, %c0_51, %c0_52], %107 {strides = array<i32>} : memref<8x8x128xf32, #tpu.memory_space<vmem>>, vector<1x8x128xf32>,
    %c6_i32 = arith.constant 6 : i32
    %108 = arith.index_cast %c6_i32 : i32 to index
    %c0_53 = arith.constant 0 : index
    %c0_54 = arith.constant 0 : index
    %109 = vector.load %arg2[%108, %c0_53, %c0_54] : memref<8x8x6xbf16, #tpu.memory_space<vmem>>, vector<1x8x6xbf16>
    %110 = vector.shape_cast %109 : vector<1x8x6xbf16> to vector<8x6xbf16>
    %cst_55 = arith.constant dense<0.000000e+00> : vector<8x256xf32>
    %111 = tpu.matmul %110, %10, %cst_55 {dimension_numbers = #tpu.dot_dimension_numbers<[1], [0], [0], [1], [0, 0, 1, 1], [], []>} : vector<8x6xbf16>, vector<6x256xbf16>, vector<8x256xf32> -> vector<8x256xf32>
    %112 = vector.broadcast %11 : vector<1x256xf32> to vector<8x256xf32>
    %113 = arith.addf %111, %112 : vector<8x256xf32>
    %114 = vector.extract_strided_slice %113 {offsets = [0, 0], sizes = [8, 128], strides = [1, 1]} : vector<8x256xf32> to vector<8x128xf32>
    %115 = arith.index_cast %c6_i32 : i32 to index
    %c0_56 = arith.constant 0 : index
    %c0_57 = arith.constant 0 : index
    %116 = vector.load %arg10[%115, %c0_56, %c0_57] : memref<8x8x128xf32, #tpu.memory_space<vmem>>, vector<1x8x128xf32>
    %117 = vector.shape_cast %116 : vector<1x8x128xf32> to vector<8x128xf32>
    %118 = vector.shape_cast %114 : vector<8x128xf32> to vector<1x8x128xf32>
    tpu.vector_store %arg10[%115, %c0_56, %c0_57], %118 {strides = array<i32>} : memref<8x8x128xf32, #tpu.memory_space<vmem>>, vector<1x8x128xf32>,
    %119 = vector.extract_strided_slice %113 {offsets = [0, 128], sizes = [8, 128], strides = [1, 1]} : vector<8x256xf32> to vector<8x128xf32>
    %120 = arith.index_cast %c6_i32 : i32 to index
    %c0_58 = arith.constant 0 : index
    %c0_59 = arith.constant 0 : index
    %121 = vector.load %arg11[%120, %c0_58, %c0_59] : memref<8x8x128xf32, #tpu.memory_space<vmem>>, vector<1x8x128xf32>
    %122 = vector.shape_cast %121 : vector<1x8x128xf32> to vector<8x128xf32>
    %123 = vector.shape_cast %119 : vector<8x128xf32> to vector<1x8x128xf32>
    tpu.vector_store %arg11[%120, %c0_58, %c0_59], %123 {strides = array<i32>} : memref<8x8x128xf32, #tpu.memory_space<vmem>>, vector<1x8x128xf32>,
    %c7_i32 = arith.constant 7 : i32
    %124 = arith.index_cast %c7_i32 : i32 to index
    %c0_60 = arith.constant 0 : index
    %c0_61 = arith.constant 0 : index
    %125 = vector.load %arg2[%124, %c0_60, %c0_61] : memref<8x8x6xbf16, #tpu.memory_space<vmem>>, vector<1x8x6xbf16>
    %126 = vector.shape_cast %125 : vector<1x8x6xbf16> to vector<8x6xbf16>
    %cst_62 = arith.constant dense<0.000000e+00> : vector<8x256xf32>
    %127 = tpu.matmul %126, %10, %cst_62 {dimension_numbers = #tpu.dot_dimension_numbers<[1], [0], [0], [1], [0, 0, 1, 1], [], []>} : vector<8x6xbf16>, vector<6x256xbf16>, vector<8x256xf32> -> vector<8x256xf32>
    %128 = vector.broadcast %11 : vector<1x256xf32> to vector<8x256xf32>
    %129 = arith.addf %127, %128 : vector<8x256xf32>
    %130 = vector.extract_strided_slice %129 {offsets = [0, 0], sizes = [8, 128], strides = [1, 1]} : vector<8x256xf32> to vector<8x128xf32>
    %131 = arith.index_cast %c7_i32 : i32 to index
    %c0_63 = arith.constant 0 : index
    %c0_64 = arith.constant 0 : index
    %132 = vector.load %arg10[%131, %c0_63, %c0_64] : memref<8x8x128xf32, #tpu.memory_space<vmem>>, vector<1x8x128xf32>
    %133 = vector.shape_cast %132 : vector<1x8x128xf32> to vector<8x128xf32>
    %134 = vector.shape_cast %130 : vector<8x128xf32> to vector<1x8x128xf32>
    tpu.vector_store %arg10[%131, %c0_63, %c0_64], %134 {strides = array<i32>} : memref<8x8x128xf32, #tpu.memory_space<vmem>>, vector<1x8x128xf32>,
    %135 = vector.extract_strided_slice %129 {offsets = [0, 128], sizes = [8, 128], strides = [1, 1]} : vector<8x256xf32> to vector<8x128xf32>
    %136 = arith.index_cast %c7_i32 : i32 to index
    %c0_65 = arith.constant 0 : index
    %c0_66 = arith.constant 0 : index
    %137 = vector.load %arg11[%136, %c0_65, %c0_66] : memref<8x8x128xf32, #tpu.memory_space<vmem>>, vector<1x8x128xf32>
    %138 = vector.shape_cast %137 : vector<1x8x128xf32> to vector<8x128xf32>
    %139 = vector.shape_cast %135 : vector<8x128xf32> to vector<1x8x128xf32>
    tpu.vector_store %arg11[%136, %c0_65, %c0_66], %139 {strides = array<i32>} : memref<8x8x128xf32, #tpu.memory_space<vmem>>, vector<1x8x128xf32>,
    %c8_i32 = arith.constant 8 : i32
    %c0_67 = arith.constant 0 : index
    %c0_68 = arith.constant 0 : index
    %140 = vector.load %arg5[%c0_67, %c0_68] : memref<32x128xbf16, #tpu.memory_space<vmem>>, vector<32x128xbf16>
    %c0_69 = arith.constant 0 : index
    %c0_70 = arith.constant 0 : index
    %141 = vector.load %arg6[%c0_69, %c0_70] : memref<32x128xbf16, #tpu.memory_space<vmem>>, vector<32x128xbf16>
    %142 = tpu.iota {dimensions = array<i32: 1>} : vector<8x128xi32>
    %c64_i32 = arith.constant 64 : i32
    %143 = vector.broadcast %c64_i32 : i32 to vector<8x128xi32>
    %144 = arith.cmpi sge, %142, %143 : vector<8x128xi32>
    %c96_i32 = arith.constant 96 : i32
    %145 = vector.broadcast %c96_i32 : i32 to vector<8x128xi32>
    %146 = arith.cmpi slt, %142, %145 : vector<8x128xi32>
    %147 = arith.andi %144, %146 : vector<8x128xi1>
    %c0_i32_71 = arith.constant 0 : i32
    %148 = arith.index_cast %c0_i32_71 : i32 to index
    %c0_72 = arith.constant 0 : index
    %c0_73 = arith.constant 0 : index
    %149 = vector.load %arg10[%148, %c0_72, %c0_73] : memref<8x8x128xf32, #tpu.memory_space<vmem>>, vector<1x8x128xf32>
    %150 = vector.shape_cast %149 : vector<1x8x128xf32> to vector<8x128xf32>
    %c7_i32_74 = arith.constant 7 : i32
    %151 = arith.subi %c7_i32_74, %c0_i32_71 : i32
    %152 = arith.index_cast %151 : i32 to index
    %c0_75 = arith.constant 0 : index
    %c0_76 = arith.constant 0 : index
    %153 = vector.load %arg11[%152, %c0_75, %c0_76] : memref<8x8x128xf32, #tpu.memory_space<vmem>>, vector<1x8x128xf32>
    %154 = vector.shape_cast %153 : vector<1x8x128xf32> to vector<8x128xf32>
    %155 = arith.truncf %6 : vector<8x32xf32> to vector<8x32xbf16>
    %cst_77 = arith.constant dense<0.000000e+00> : vector<8x128xf32>
    %156 = tpu.matmul %155, %140, %cst_77 {dimension_numbers = #tpu.dot_dimension_numbers<[1], [0], [0], [1], [0, 0, 1, 1], [], []>} : vector<8x32xbf16>, vector<32x128xbf16>, vector<8x128xf32> -> vector<8x128xf32>
    %157 = arith.addf %156, %150 : vector<8x128xf32>
    %158 = arith.truncf %8 : vector<8x32xf32> to vector<8x32xbf16>
    %cst_78 = arith.constant dense<0.000000e+00> : vector<8x128xf32>
    %159 = tpu.matmul %158, %141, %cst_78 {dimension_numbers = #tpu.dot_dimension_numbers<[1], [0], [0], [1], [0, 0, 1, 1], [], []>} : vector<8x32xbf16>, vector<32x128xbf16>, vector<8x128xf32> -> vector<8x128xf32>
    %160 = arith.addf %159, %154 : vector<8x128xf32>
    %161 = math.tanh %157 : vector<8x128xf32>
    %cst_79 = arith.constant 5.000000e-01 : f32
    %162 = vector.broadcast %cst_79 : f32 to vector<8x128xf32>
    %163 = arith.mulf %162, %161 : vector<8x128xf32>
    %cst_80 = arith.constant 5.000000e-01 : f32
    %164 = vector.broadcast %cst_80 : f32 to vector<8x128xf32>
    %165 = arith.addf %163, %164 : vector<8x128xf32>
    %166 = arith.select %147, %161, %165 : vector<8x128xi1>, vector<8x128xf32>
    %167 = vector.extract_strided_slice %166 {offsets = [0, 0], sizes = [8, 32], strides = [1, 1]} : vector<8x128xf32> to vector<8x32xf32>
    %168 = vector.extract_strided_slice %166 {offsets = [0, 32], sizes = [8, 32], strides = [1, 1]} : vector<8x128xf32> to vector<8x32xf32>
    %169 = vector.extract_strided_slice %166 {offsets = [0, 64], sizes = [8, 32], strides = [1, 1]} : vector<8x128xf32> to vector<8x32xf32>
    %170 = vector.extract_strided_slice %166 {offsets = [0, 96], sizes = [8, 32], strides = [1, 1]} : vector<8x128xf32> to vector<8x32xf32>
    %171 = arith.mulf %168, %7 : vector<8x32xf32>
    %172 = arith.mulf %167, %169 : vector<8x32xf32>
    %173 = arith.addf %171, %172 : vector<8x32xf32>
    %174 = math.tanh %173 : vector<8x32xf32>
    %175 = arith.mulf %170, %174 : vector<8x32xf32>
    %176 = math.tanh %160 : vector<8x128xf32>
    %cst_81 = arith.constant 5.000000e-01 : f32
    %177 = vector.broadcast %cst_81 : f32 to vector<8x128xf32>
    %178 = arith.mulf %177, %176 : vector<8x128xf32>
    %cst_82 = arith.constant 5.000000e-01 : f32
    %179 = vector.broadcast %cst_82 : f32 to vector<8x128xf32>
    %180 = arith.addf %178, %179 : vector<8x128xf32>
    %181 = arith.select %147, %176, %180 : vector<8x128xi1>, vector<8x128xf32>
    %182 = vector.extract_strided_slice %181 {offsets = [0, 0], sizes = [8, 32], strides = [1, 1]} : vector<8x128xf32> to vector<8x32xf32>
    %183 = vector.extract_strided_slice %181 {offsets = [0, 32], sizes = [8, 32], strides = [1, 1]} : vector<8x128xf32> to vector<8x32xf32>
    %184 = vector.extract_strided_slice %181 {offsets = [0, 64], sizes = [8, 32], strides = [1, 1]} : vector<8x128xf32> to vector<8x32xf32>
    %185 = vector.extract_strided_slice %181 {offsets = [0, 96], sizes = [8, 32], strides = [1, 1]} : vector<8x128xf32> to vector<8x32xf32>
    %186 = arith.mulf %183, %9 : vector<8x32xf32>
    %187 = arith.mulf %182, %184 : vector<8x32xf32>
    %188 = arith.addf %186, %187 : vector<8x32xf32>
    %189 = math.tanh %188 : vector<8x32xf32>
    %190 = arith.mulf %185, %189 : vector<8x32xf32>
    %c1_i32_83 = arith.constant 1 : i32
    %191 = arith.index_cast %c1_i32_83 : i32 to index
    %c0_84 = arith.constant 0 : index
    %c0_85 = arith.constant 0 : index
    %192 = vector.load %arg10[%191, %c0_84, %c0_85] : memref<8x8x128xf32, #tpu.memory_space<vmem>>, vector<1x8x128xf32>
    %193 = vector.shape_cast %192 : vector<1x8x128xf32> to vector<8x128xf32>
    %c7_i32_86 = arith.constant 7 : i32
    %194 = arith.subi %c7_i32_86, %c1_i32_83 : i32
    %195 = arith.index_cast %194 : i32 to index
    %c0_87 = arith.constant 0 : index
    %c0_88 = arith.constant 0 : index
    %196 = vector.load %arg11[%195, %c0_87, %c0_88] : memref<8x8x128xf32, #tpu.memory_space<vmem>>, vector<1x8x128xf32>
    %197 = vector.shape_cast %196 : vector<1x8x128xf32> to vector<8x128xf32>
    %198 = arith.truncf %175 : vector<8x32xf32> to vector<8x32xbf16>
    %cst_89 = arith.constant dense<0.000000e+00> : vector<8x128xf32>
    %199 = tpu.matmul %198, %140, %cst_89 {dimension_numbers = #tpu.dot_dimension_numbers<[1], [0], [0], [1], [0, 0, 1, 1], [], []>} : vector<8x32xbf16>, vector<32x128xbf16>, vector<8x128xf32> -> vector<8x128xf32>
    %200 = arith.addf %199, %193 : vector<8x128xf32>
    %201 = arith.truncf %190 : vector<8x32xf32> to vector<8x32xbf16>
    %cst_90 = arith.constant dense<0.000000e+00> : vector<8x128xf32>
    %202 = tpu.matmul %201, %141, %cst_90 {dimension_numbers = #tpu.dot_dimension_numbers<[1], [0], [0], [1], [0, 0, 1, 1], [], []>} : vector<8x32xbf16>, vector<32x128xbf16>, vector<8x128xf32> -> vector<8x128xf32>
    %203 = arith.addf %202, %197 : vector<8x128xf32>
    %204 = math.tanh %200 : vector<8x128xf32>
    %cst_91 = arith.constant 5.000000e-01 : f32
    %205 = vector.broadcast %cst_91 : f32 to vector<8x128xf32>
    %206 = arith.mulf %205, %204 : vector<8x128xf32>
    %cst_92 = arith.constant 5.000000e-01 : f32
    %207 = vector.broadcast %cst_92 : f32 to vector<8x128xf32>
    %208 = arith.addf %206, %207 : vector<8x128xf32>
    %209 = arith.select %147, %204, %208 : vector<8x128xi1>, vector<8x128xf32>
    %210 = vector.extract_strided_slice %209 {offsets = [0, 0], sizes = [8, 32], strides = [1, 1]} : vector<8x128xf32> to vector<8x32xf32>
    %211 = vector.extract_strided_slice %209 {offsets = [0, 32], sizes = [8, 32], strides = [1, 1]} : vector<8x128xf32> to vector<8x32xf32>
    %212 = vector.extract_strided_slice %209 {offsets = [0, 64], sizes = [8, 32], strides = [1, 1]} : vector<8x128xf32> to vector<8x32xf32>
    %213 = vector.extract_strided_slice %209 {offsets = [0, 96], sizes = [8, 32], strides = [1, 1]} : vector<8x128xf32> to vector<8x32xf32>
    %214 = arith.mulf %211, %173 : vector<8x32xf32>
    %215 = arith.mulf %210, %212 : vector<8x32xf32>
    %216 = arith.addf %214, %215 : vector<8x32xf32>
    %217 = math.tanh %216 : vector<8x32xf32>
    %218 = arith.mulf %213, %217 : vector<8x32xf32>
    %219 = math.tanh %203 : vector<8x128xf32>
    %cst_93 = arith.constant 5.000000e-01 : f32
    %220 = vector.broadcast %cst_93 : f32 to vector<8x128xf32>
    %221 = arith.mulf %220, %219 : vector<8x128xf32>
    %cst_94 = arith.constant 5.000000e-01 : f32
    %222 = vector.broadcast %cst_94 : f32 to vector<8x128xf32>
    %223 = arith.addf %221, %222 : vector<8x128xf32>
    %224 = arith.select %147, %219, %223 : vector<8x128xi1>, vector<8x128xf32>
    %225 = vector.extract_strided_slice %224 {offsets = [0, 0], sizes = [8, 32], strides = [1, 1]} : vector<8x128xf32> to vector<8x32xf32>
    %226 = vector.extract_strided_slice %224 {offsets = [0, 32], sizes = [8, 32], strides = [1, 1]} : vector<8x128xf32> to vector<8x32xf32>
    %227 = vector.extract_strided_slice %224 {offsets = [0, 64], sizes = [8, 32], strides = [1, 1]} : vector<8x128xf32> to vector<8x32xf32>
    %228 = vector.extract_strided_slice %224 {offsets = [0, 96], sizes = [8, 32], strides = [1, 1]} : vector<8x128xf32> to vector<8x32xf32>
    %229 = arith.mulf %226, %188 : vector<8x32xf32>
    %230 = arith.mulf %225, %227 : vector<8x32xf32>
    %231 = arith.addf %229, %230 : vector<8x32xf32>
    %232 = math.tanh %231 : vector<8x32xf32>
    %233 = arith.mulf %228, %232 : vector<8x32xf32>
    %c2_i32_95 = arith.constant 2 : i32
    %234 = arith.index_cast %c2_i32_95 : i32 to index
    %c0_96 = arith.constant 0 : index
    %c0_97 = arith.constant 0 : index
    %235 = vector.load %arg10[%234, %c0_96, %c0_97] : memref<8x8x128xf32, #tpu.memory_space<vmem>>, vector<1x8x128xf32>
    %236 = vector.shape_cast %235 : vector<1x8x128xf32> to vector<8x128xf32>
    %c7_i32_98 = arith.constant 7 : i32
    %237 = arith.subi %c7_i32_98, %c2_i32_95 : i32
    %238 = arith.index_cast %237 : i32 to index
    %c0_99 = arith.constant 0 : index
    %c0_100 = arith.constant 0 : index
    %239 = vector.load %arg11[%238, %c0_99, %c0_100] : memref<8x8x128xf32, #tpu.memory_space<vmem>>, vector<1x8x128xf32>
    %240 = vector.shape_cast %239 : vector<1x8x128xf32> to vector<8x128xf32>
    %241 = arith.truncf %218 : vector<8x32xf32> to vector<8x32xbf16>
    %cst_101 = arith.constant dense<0.000000e+00> : vector<8x128xf32>
    %242 = tpu.matmul %241, %140, %cst_101 {dimension_numbers = #tpu.dot_dimension_numbers<[1], [0], [0], [1], [0, 0, 1, 1], [], []>} : vector<8x32xbf16>, vector<32x128xbf16>, vector<8x128xf32> -> vector<8x128xf32>
    %243 = arith.addf %242, %236 : vector<8x128xf32>
    %244 = arith.truncf %233 : vector<8x32xf32> to vector<8x32xbf16>
    %cst_102 = arith.constant dense<0.000000e+00> : vector<8x128xf32>
    %245 = tpu.matmul %244, %141, %cst_102 {dimension_numbers = #tpu.dot_dimension_numbers<[1], [0], [0], [1], [0, 0, 1, 1], [], []>} : vector<8x32xbf16>, vector<32x128xbf16>, vector<8x128xf32> -> vector<8x128xf32>
    %246 = arith.addf %245, %240 : vector<8x128xf32>
    %247 = math.tanh %243 : vector<8x128xf32>
    %cst_103 = arith.constant 5.000000e-01 : f32
    %248 = vector.broadcast %cst_103 : f32 to vector<8x128xf32>
    %249 = arith.mulf %248, %247 : vector<8x128xf32>
    %cst_104 = arith.constant 5.000000e-01 : f32
    %250 = vector.broadcast %cst_104 : f32 to vector<8x128xf32>
    %251 = arith.addf %249, %250 : vector<8x128xf32>
    %252 = arith.select %147, %247, %251 : vector<8x128xi1>, vector<8x128xf32>
    %253 = vector.extract_strided_slice %252 {offsets = [0, 0], sizes = [8, 32], strides = [1, 1]} : vector<8x128xf32> to vector<8x32xf32>
    %254 = vector.extract_strided_slice %252 {offsets = [0, 32], sizes = [8, 32], strides = [1, 1]} : vector<8x128xf32> to vector<8x32xf32>
    %255 = vector.extract_strided_slice %252 {offsets = [0, 64], sizes = [8, 32], strides = [1, 1]} : vector<8x128xf32> to vector<8x32xf32>
    %256 = vector.extract_strided_slice %252 {offsets = [0, 96], sizes = [8, 32], strides = [1, 1]} : vector<8x128xf32> to vector<8x32xf32>
    %257 = arith.mulf %254, %216 : vector<8x32xf32>
    %258 = arith.mulf %253, %255 : vector<8x32xf32>
    %259 = arith.addf %257, %258 : vector<8x32xf32>
    %260 = math.tanh %259 : vector<8x32xf32>
    %261 = arith.mulf %256, %260 : vector<8x32xf32>
    %262 = math.tanh %246 : vector<8x128xf32>
    %cst_105 = arith.constant 5.000000e-01 : f32
    %263 = vector.broadcast %cst_105 : f32 to vector<8x128xf32>
    %264 = arith.mulf %263, %262 : vector<8x128xf32>
    %cst_106 = arith.constant 5.000000e-01 : f32
    %265 = vector.broadcast %cst_106 : f32 to vector<8x128xf32>
    %266 = arith.addf %264, %265 : vector<8x128xf32>
    %267 = arith.select %147, %262, %266 : vector<8x128xi1>, vector<8x128xf32>
    %268 = vector.extract_strided_slice %267 {offsets = [0, 0], sizes = [8, 32], strides = [1, 1]} : vector<8x128xf32> to vector<8x32xf32>
    %269 = vector.extract_strided_slice %267 {offsets = [0, 32], sizes = [8, 32], strides = [1, 1]} : vector<8x128xf32> to vector<8x32xf32>
    %270 = vector.extract_strided_slice %267 {offsets = [0, 64], sizes = [8, 32], strides = [1, 1]} : vector<8x128xf32> to vector<8x32xf32>
    %271 = vector.extract_strided_slice %267 {offsets = [0, 96], sizes = [8, 32], strides = [1, 1]} : vector<8x128xf32> to vector<8x32xf32>
    %272 = arith.mulf %269, %231 : vector<8x32xf32>
    %273 = arith.mulf %268, %270 : vector<8x32xf32>
    %274 = arith.addf %272, %273 : vector<8x32xf32>
    %275 = math.tanh %274 : vector<8x32xf32>
    %276 = arith.mulf %271, %275 : vector<8x32xf32>
    %c3_i32_107 = arith.constant 3 : i32
    %277 = arith.index_cast %c3_i32_107 : i32 to index
    %c0_108 = arith.constant 0 : index
    %c0_109 = arith.constant 0 : index
    %278 = vector.load %arg10[%277, %c0_108, %c0_109] : memref<8x8x128xf32, #tpu.memory_space<vmem>>, vector<1x8x128xf32>
    %279 = vector.shape_cast %278 : vector<1x8x128xf32> to vector<8x128xf32>
    %c7_i32_110 = arith.constant 7 : i32
    %280 = arith.subi %c7_i32_110, %c3_i32_107 : i32
    %281 = arith.index_cast %280 : i32 to index
    %c0_111 = arith.constant 0 : index
    %c0_112 = arith.constant 0 : index
    %282 = vector.load %arg11[%281, %c0_111, %c0_112] : memref<8x8x128xf32, #tpu.memory_space<vmem>>, vector<1x8x128xf32>
    %283 = vector.shape_cast %282 : vector<1x8x128xf32> to vector<8x128xf32>
    %284 = arith.truncf %261 : vector<8x32xf32> to vector<8x32xbf16>
    %cst_113 = arith.constant dense<0.000000e+00> : vector<8x128xf32>
    %285 = tpu.matmul %284, %140, %cst_113 {dimension_numbers = #tpu.dot_dimension_numbers<[1], [0], [0], [1], [0, 0, 1, 1], [], []>} : vector<8x32xbf16>, vector<32x128xbf16>, vector<8x128xf32> -> vector<8x128xf32>
    %286 = arith.addf %285, %279 : vector<8x128xf32>
    %287 = arith.truncf %276 : vector<8x32xf32> to vector<8x32xbf16>
    %cst_114 = arith.constant dense<0.000000e+00> : vector<8x128xf32>
    %288 = tpu.matmul %287, %141, %cst_114 {dimension_numbers = #tpu.dot_dimension_numbers<[1], [0], [0], [1], [0, 0, 1, 1], [], []>} : vector<8x32xbf16>, vector<32x128xbf16>, vector<8x128xf32> -> vector<8x128xf32>
    %289 = arith.addf %288, %283 : vector<8x128xf32>
    %290 = math.tanh %286 : vector<8x128xf32>
    %cst_115 = arith.constant 5.000000e-01 : f32
    %291 = vector.broadcast %cst_115 : f32 to vector<8x128xf32>
    %292 = arith.mulf %291, %290 : vector<8x128xf32>
    %cst_116 = arith.constant 5.000000e-01 : f32
    %293 = vector.broadcast %cst_116 : f32 to vector<8x128xf32>
    %294 = arith.addf %292, %293 : vector<8x128xf32>
    %295 = arith.select %147, %290, %294 : vector<8x128xi1>, vector<8x128xf32>
    %296 = vector.extract_strided_slice %295 {offsets = [0, 0], sizes = [8, 32], strides = [1, 1]} : vector<8x128xf32> to vector<8x32xf32>
    %297 = vector.extract_strided_slice %295 {offsets = [0, 32], sizes = [8, 32], strides = [1, 1]} : vector<8x128xf32> to vector<8x32xf32>
    %298 = vector.extract_strided_slice %295 {offsets = [0, 64], sizes = [8, 32], strides = [1, 1]} : vector<8x128xf32> to vector<8x32xf32>
    %299 = vector.extract_strided_slice %295 {offsets = [0, 96], sizes = [8, 32], strides = [1, 1]} : vector<8x128xf32> to vector<8x32xf32>
    %300 = arith.mulf %297, %259 : vector<8x32xf32>
    %301 = arith.mulf %296, %298 : vector<8x32xf32>
    %302 = arith.addf %300, %301 : vector<8x32xf32>
    %303 = math.tanh %302 : vector<8x32xf32>
    %304 = arith.mulf %299, %303 : vector<8x32xf32>
    %305 = math.tanh %289 : vector<8x128xf32>
    %cst_117 = arith.constant 5.000000e-01 : f32
    %306 = vector.broadcast %cst_117 : f32 to vector<8x128xf32>
    %307 = arith.mulf %306, %305 : vector<8x128xf32>
    %cst_118 = arith.constant 5.000000e-01 : f32
    %308 = vector.broadcast %cst_118 : f32 to vector<8x128xf32>
    %309 = arith.addf %307, %308 : vector<8x128xf32>
    %310 = arith.select %147, %305, %309 : vector<8x128xi1>, vector<8x128xf32>
    %311 = vector.extract_strided_slice %310 {offsets = [0, 0], sizes = [8, 32], strides = [1, 1]} : vector<8x128xf32> to vector<8x32xf32>
    %312 = vector.extract_strided_slice %310 {offsets = [0, 32], sizes = [8, 32], strides = [1, 1]} : vector<8x128xf32> to vector<8x32xf32>
    %313 = vector.extract_strided_slice %310 {offsets = [0, 64], sizes = [8, 32], strides = [1, 1]} : vector<8x128xf32> to vector<8x32xf32>
    %314 = vector.extract_strided_slice %310 {offsets = [0, 96], sizes = [8, 32], strides = [1, 1]} : vector<8x128xf32> to vector<8x32xf32>
    %315 = arith.mulf %312, %274 : vector<8x32xf32>
    %316 = arith.mulf %311, %313 : vector<8x32xf32>
    %317 = arith.addf %315, %316 : vector<8x32xf32>
    %318 = math.tanh %317 : vector<8x32xf32>
    %319 = arith.mulf %314, %318 : vector<8x32xf32>
    %c4_i32_119 = arith.constant 4 : i32
    %320 = arith.index_cast %c4_i32_119 : i32 to index
    %c0_120 = arith.constant 0 : index
    %c0_121 = arith.constant 0 : index
    %321 = vector.load %arg10[%320, %c0_120, %c0_121] : memref<8x8x128xf32, #tpu.memory_space<vmem>>, vector<1x8x128xf32>
    %322 = vector.shape_cast %321 : vector<1x8x128xf32> to vector<8x128xf32>
    %c7_i32_122 = arith.constant 7 : i32
    %323 = arith.subi %c7_i32_122, %c4_i32_119 : i32
    %324 = arith.index_cast %323 : i32 to index
    %c0_123 = arith.constant 0 : index
    %c0_124 = arith.constant 0 : index
    %325 = vector.load %arg11[%324, %c0_123, %c0_124] : memref<8x8x128xf32, #tpu.memory_space<vmem>>, vector<1x8x128xf32>
    %326 = vector.shape_cast %325 : vector<1x8x128xf32> to vector<8x128xf32>
    %327 = arith.truncf %304 : vector<8x32xf32> to vector<8x32xbf16>
    %cst_125 = arith.constant dense<0.000000e+00> : vector<8x128xf32>
    %328 = tpu.matmul %327, %140, %cst_125 {dimension_numbers = #tpu.dot_dimension_numbers<[1], [0], [0], [1], [0, 0, 1, 1], [], []>} : vector<8x32xbf16>, vector<32x128xbf16>, vector<8x128xf32> -> vector<8x128xf32>
    %329 = arith.addf %328, %322 : vector<8x128xf32>
    %330 = arith.truncf %319 : vector<8x32xf32> to vector<8x32xbf16>
    %cst_126 = arith.constant dense<0.000000e+00> : vector<8x128xf32>
    %331 = tpu.matmul %330, %141, %cst_126 {dimension_numbers = #tpu.dot_dimension_numbers<[1], [0], [0], [1], [0, 0, 1, 1], [], []>} : vector<8x32xbf16>, vector<32x128xbf16>, vector<8x128xf32> -> vector<8x128xf32>
    %332 = arith.addf %331, %326 : vector<8x128xf32>
    %333 = math.tanh %329 : vector<8x128xf32>
    %cst_127 = arith.constant 5.000000e-01 : f32
    %334 = vector.broadcast %cst_127 : f32 to vector<8x128xf32>
    %335 = arith.mulf %334, %333 : vector<8x128xf32>
    %cst_128 = arith.constant 5.000000e-01 : f32
    %336 = vector.broadcast %cst_128 : f32 to vector<8x128xf32>
    %337 = arith.addf %335, %336 : vector<8x128xf32>
    %338 = arith.select %147, %333, %337 : vector<8x128xi1>, vector<8x128xf32>
    %339 = vector.extract_strided_slice %338 {offsets = [0, 0], sizes = [8, 32], strides = [1, 1]} : vector<8x128xf32> to vector<8x32xf32>
    %340 = vector.extract_strided_slice %338 {offsets = [0, 32], sizes = [8, 32], strides = [1, 1]} : vector<8x128xf32> to vector<8x32xf32>
    %341 = vector.extract_strided_slice %338 {offsets = [0, 64], sizes = [8, 32], strides = [1, 1]} : vector<8x128xf32> to vector<8x32xf32>
    %342 = vector.extract_strided_slice %338 {offsets = [0, 96], sizes = [8, 32], strides = [1, 1]} : vector<8x128xf32> to vector<8x32xf32>
    %343 = arith.mulf %340, %302 : vector<8x32xf32>
    %344 = arith.mulf %339, %341 : vector<8x32xf32>
    %345 = arith.addf %343, %344 : vector<8x32xf32>
    %346 = math.tanh %345 : vector<8x32xf32>
    %347 = arith.mulf %342, %346 : vector<8x32xf32>
    %348 = math.tanh %332 : vector<8x128xf32>
    %cst_129 = arith.constant 5.000000e-01 : f32
    %349 = vector.broadcast %cst_129 : f32 to vector<8x128xf32>
    %350 = arith.mulf %349, %348 : vector<8x128xf32>
    %cst_130 = arith.constant 5.000000e-01 : f32
    %351 = vector.broadcast %cst_130 : f32 to vector<8x128xf32>
    %352 = arith.addf %350, %351 : vector<8x128xf32>
    %353 = arith.select %147, %348, %352 : vector<8x128xi1>, vector<8x128xf32>
    %354 = vector.extract_strided_slice %353 {offsets = [0, 0], sizes = [8, 32], strides = [1, 1]} : vector<8x128xf32> to vector<8x32xf32>
    %355 = vector.extract_strided_slice %353 {offsets = [0, 32], sizes = [8, 32], strides = [1, 1]} : vector<8x128xf32> to vector<8x32xf32>
    %356 = vector.extract_strided_slice %353 {offsets = [0, 64], sizes = [8, 32], strides = [1, 1]} : vector<8x128xf32> to vector<8x32xf32>
    %357 = vector.extract_strided_slice %353 {offsets = [0, 96], sizes = [8, 32], strides = [1, 1]} : vector<8x128xf32> to vector<8x32xf32>
    %358 = arith.mulf %355, %317 : vector<8x32xf32>
    %359 = arith.mulf %354, %356 : vector<8x32xf32>
    %360 = arith.addf %358, %359 : vector<8x32xf32>
    %361 = math.tanh %360 : vector<8x32xf32>
    %362 = arith.mulf %357, %361 : vector<8x32xf32>
    %c5_i32_131 = arith.constant 5 : i32
    %363 = arith.index_cast %c5_i32_131 : i32 to index
    %c0_132 = arith.constant 0 : index
    %c0_133 = arith.constant 0 : index
    %364 = vector.load %arg10[%363, %c0_132, %c0_133] : memref<8x8x128xf32, #tpu.memory_space<vmem>>, vector<1x8x128xf32>
    %365 = vector.shape_cast %364 : vector<1x8x128xf32> to vector<8x128xf32>
    %c7_i32_134 = arith.constant 7 : i32
    %366 = arith.subi %c7_i32_134, %c5_i32_131 : i32
    %367 = arith.index_cast %366 : i32 to index
    %c0_135 = arith.constant 0 : index
    %c0_136 = arith.constant 0 : index
    %368 = vector.load %arg11[%367, %c0_135, %c0_136] : memref<8x8x128xf32, #tpu.memory_space<vmem>>, vector<1x8x128xf32>
    %369 = vector.shape_cast %368 : vector<1x8x128xf32> to vector<8x128xf32>
    %370 = arith.truncf %347 : vector<8x32xf32> to vector<8x32xbf16>
    %cst_137 = arith.constant dense<0.000000e+00> : vector<8x128xf32>
    %371 = tpu.matmul %370, %140, %cst_137 {dimension_numbers = #tpu.dot_dimension_numbers<[1], [0], [0], [1], [0, 0, 1, 1], [], []>} : vector<8x32xbf16>, vector<32x128xbf16>, vector<8x128xf32> -> vector<8x128xf32>
    %372 = arith.addf %371, %365 : vector<8x128xf32>
    %373 = arith.truncf %362 : vector<8x32xf32> to vector<8x32xbf16>
    %cst_138 = arith.constant dense<0.000000e+00> : vector<8x128xf32>
    %374 = tpu.matmul %373, %141, %cst_138 {dimension_numbers = #tpu.dot_dimension_numbers<[1], [0], [0], [1], [0, 0, 1, 1], [], []>} : vector<8x32xbf16>, vector<32x128xbf16>, vector<8x128xf32> -> vector<8x128xf32>
    %375 = arith.addf %374, %369 : vector<8x128xf32>
    %376 = math.tanh %372 : vector<8x128xf32>
    %cst_139 = arith.constant 5.000000e-01 : f32
    %377 = vector.broadcast %cst_139 : f32 to vector<8x128xf32>
    %378 = arith.mulf %377, %376 : vector<8x128xf32>
    %cst_140 = arith.constant 5.000000e-01 : f32
    %379 = vector.broadcast %cst_140 : f32 to vector<8x128xf32>
    %380 = arith.addf %378, %379 : vector<8x128xf32>
    %381 = arith.select %147, %376, %380 : vector<8x128xi1>, vector<8x128xf32>
    %382 = vector.extract_strided_slice %381 {offsets = [0, 0], sizes = [8, 32], strides = [1, 1]} : vector<8x128xf32> to vector<8x32xf32>
    %383 = vector.extract_strided_slice %381 {offsets = [0, 32], sizes = [8, 32], strides = [1, 1]} : vector<8x128xf32> to vector<8x32xf32>
    %384 = vector.extract_strided_slice %381 {offsets = [0, 64], sizes = [8, 32], strides = [1, 1]} : vector<8x128xf32> to vector<8x32xf32>
    %385 = vector.extract_strided_slice %381 {offsets = [0, 96], sizes = [8, 32], strides = [1, 1]} : vector<8x128xf32> to vector<8x32xf32>
    %386 = arith.mulf %383, %345 : vector<8x32xf32>
    %387 = arith.mulf %382, %384 : vector<8x32xf32>
    %388 = arith.addf %386, %387 : vector<8x32xf32>
    %389 = math.tanh %388 : vector<8x32xf32>
    %390 = arith.mulf %385, %389 : vector<8x32xf32>
    %391 = math.tanh %375 : vector<8x128xf32>
    %cst_141 = arith.constant 5.000000e-01 : f32
    %392 = vector.broadcast %cst_141 : f32 to vector<8x128xf32>
    %393 = arith.mulf %392, %391 : vector<8x128xf32>
    %cst_142 = arith.constant 5.000000e-01 : f32
    %394 = vector.broadcast %cst_142 : f32 to vector<8x128xf32>
    %395 = arith.addf %393, %394 : vector<8x128xf32>
    %396 = arith.select %147, %391, %395 : vector<8x128xi1>, vector<8x128xf32>
    %397 = vector.extract_strided_slice %396 {offsets = [0, 0], sizes = [8, 32], strides = [1, 1]} : vector<8x128xf32> to vector<8x32xf32>
    %398 = vector.extract_strided_slice %396 {offsets = [0, 32], sizes = [8, 32], strides = [1, 1]} : vector<8x128xf32> to vector<8x32xf32>
    %399 = vector.extract_strided_slice %396 {offsets = [0, 64], sizes = [8, 32], strides = [1, 1]} : vector<8x128xf32> to vector<8x32xf32>
    %400 = vector.extract_strided_slice %396 {offsets = [0, 96], sizes = [8, 32], strides = [1, 1]} : vector<8x128xf32> to vector<8x32xf32>
    %401 = arith.mulf %398, %360 : vector<8x32xf32>
    %402 = arith.mulf %397, %399 : vector<8x32xf32>
    %403 = arith.addf %401, %402 : vector<8x32xf32>
    %404 = math.tanh %403 : vector<8x32xf32>
    %405 = arith.mulf %400, %404 : vector<8x32xf32>
    %c6_i32_143 = arith.constant 6 : i32
    %406 = arith.index_cast %c6_i32_143 : i32 to index
    %c0_144 = arith.constant 0 : index
    %c0_145 = arith.constant 0 : index
    %407 = vector.load %arg10[%406, %c0_144, %c0_145] : memref<8x8x128xf32, #tpu.memory_space<vmem>>, vector<1x8x128xf32>
    %408 = vector.shape_cast %407 : vector<1x8x128xf32> to vector<8x128xf32>
    %c7_i32_146 = arith.constant 7 : i32
    %409 = arith.subi %c7_i32_146, %c6_i32_143 : i32
    %410 = arith.index_cast %409 : i32 to index
    %c0_147 = arith.constant 0 : index
    %c0_148 = arith.constant 0 : index
    %411 = vector.load %arg11[%410, %c0_147, %c0_148] : memref<8x8x128xf32, #tpu.memory_space<vmem>>, vector<1x8x128xf32>
    %412 = vector.shape_cast %411 : vector<1x8x128xf32> to vector<8x128xf32>
    %413 = arith.truncf %390 : vector<8x32xf32> to vector<8x32xbf16>
    %cst_149 = arith.constant dense<0.000000e+00> : vector<8x128xf32>
    %414 = tpu.matmul %413, %140, %cst_149 {dimension_numbers = #tpu.dot_dimension_numbers<[1], [0], [0], [1], [0, 0, 1, 1], [], []>} : vector<8x32xbf16>, vector<32x128xbf16>, vector<8x128xf32> -> vector<8x128xf32>
    %415 = arith.addf %414, %408 : vector<8x128xf32>
    %416 = arith.truncf %405 : vector<8x32xf32> to vector<8x32xbf16>
    %cst_150 = arith.constant dense<0.000000e+00> : vector<8x128xf32>
    %417 = tpu.matmul %416, %141, %cst_150 {dimension_numbers = #tpu.dot_dimension_numbers<[1], [0], [0], [1], [0, 0, 1, 1], [], []>} : vector<8x32xbf16>, vector<32x128xbf16>, vector<8x128xf32> -> vector<8x128xf32>
    %418 = arith.addf %417, %412 : vector<8x128xf32>
    %419 = math.tanh %415 : vector<8x128xf32>
    %cst_151 = arith.constant 5.000000e-01 : f32
    %420 = vector.broadcast %cst_151 : f32 to vector<8x128xf32>
    %421 = arith.mulf %420, %419 : vector<8x128xf32>
    %cst_152 = arith.constant 5.000000e-01 : f32
    %422 = vector.broadcast %cst_152 : f32 to vector<8x128xf32>
    %423 = arith.addf %421, %422 : vector<8x128xf32>
    %424 = arith.select %147, %419, %423 : vector<8x128xi1>, vector<8x128xf32>
    %425 = vector.extract_strided_slice %424 {offsets = [0, 0], sizes = [8, 32], strides = [1, 1]} : vector<8x128xf32> to vector<8x32xf32>
    %426 = vector.extract_strided_slice %424 {offsets = [0, 32], sizes = [8, 32], strides = [1, 1]} : vector<8x128xf32> to vector<8x32xf32>
    %427 = vector.extract_strided_slice %424 {offsets = [0, 64], sizes = [8, 32], strides = [1, 1]} : vector<8x128xf32> to vector<8x32xf32>
    %428 = vector.extract_strided_slice %424 {offsets = [0, 96], sizes = [8, 32], strides = [1, 1]} : vector<8x128xf32> to vector<8x32xf32>
    %429 = arith.mulf %426, %388 : vector<8x32xf32>
    %430 = arith.mulf %425, %427 : vector<8x32xf32>
    %431 = arith.addf %429, %430 : vector<8x32xf32>
    %432 = math.tanh %431 : vector<8x32xf32>
    %433 = arith.mulf %428, %432 : vector<8x32xf32>
    %434 = math.tanh %418 : vector<8x128xf32>
    %cst_153 = arith.constant 5.000000e-01 : f32
    %435 = vector.broadcast %cst_153 : f32 to vector<8x128xf32>
    %436 = arith.mulf %435, %434 : vector<8x128xf32>
    %cst_154 = arith.constant 5.000000e-01 : f32
    %437 = vector.broadcast %cst_154 : f32 to vector<8x128xf32>
    %438 = arith.addf %436, %437 : vector<8x128xf32>
    %439 = arith.select %147, %434, %438 : vector<8x128xi1>, vector<8x128xf32>
    %440 = vector.extract_strided_slice %439 {offsets = [0, 0], sizes = [8, 32], strides = [1, 1]} : vector<8x128xf32> to vector<8x32xf32>
    %441 = vector.extract_strided_slice %439 {offsets = [0, 32], sizes = [8, 32], strides = [1, 1]} : vector<8x128xf32> to vector<8x32xf32>
    %442 = vector.extract_strided_slice %439 {offsets = [0, 64], sizes = [8, 32], strides = [1, 1]} : vector<8x128xf32> to vector<8x32xf32>
    %443 = vector.extract_strided_slice %439 {offsets = [0, 96], sizes = [8, 32], strides = [1, 1]} : vector<8x128xf32> to vector<8x32xf32>
    %444 = arith.mulf %441, %403 : vector<8x32xf32>
    %445 = arith.mulf %440, %442 : vector<8x32xf32>
    %446 = arith.addf %444, %445 : vector<8x32xf32>
    %447 = math.tanh %446 : vector<8x32xf32>
    %448 = arith.mulf %443, %447 : vector<8x32xf32>
    %c7_i32_155 = arith.constant 7 : i32
    %449 = arith.index_cast %c7_i32_155 : i32 to index
    %c0_156 = arith.constant 0 : index
    %c0_157 = arith.constant 0 : index
    %450 = vector.load %arg10[%449, %c0_156, %c0_157] : memref<8x8x128xf32, #tpu.memory_space<vmem>>, vector<1x8x128xf32>
    %451 = vector.shape_cast %450 : vector<1x8x128xf32> to vector<8x128xf32>
    %c7_i32_158 = arith.constant 7 : i32
    %452 = arith.subi %c7_i32_158, %c7_i32_155 : i32
    %453 = arith.index_cast %452 : i32 to index
    %c0_159 = arith.constant 0 : index
    %c0_160 = arith.constant 0 : index
    %454 = vector.load %arg11[%453, %c0_159, %c0_160] : memref<8x8x128xf32, #tpu.memory_space<vmem>>, vector<1x8x128xf32>
    %455 = vector.shape_cast %454 : vector<1x8x128xf32> to vector<8x128xf32>
    %456 = arith.truncf %433 : vector<8x32xf32> to vector<8x32xbf16>
    %cst_161 = arith.constant dense<0.000000e+00> : vector<8x128xf32>
    %457 = tpu.matmul %456, %140, %cst_161 {dimension_numbers = #tpu.dot_dimension_numbers<[1], [0], [0], [1], [0, 0, 1, 1], [], []>} : vector<8x32xbf16>, vector<32x128xbf16>, vector<8x128xf32> -> vector<8x128xf32>
    %458 = arith.addf %457, %451 : vector<8x128xf32>
    %459 = arith.truncf %448 : vector<8x32xf32> to vector<8x32xbf16>
    %cst_162 = arith.constant dense<0.000000e+00> : vector<8x128xf32>
    %460 = tpu.matmul %459, %141, %cst_162 {dimension_numbers = #tpu.dot_dimension_numbers<[1], [0], [0], [1], [0, 0, 1, 1], [], []>} : vector<8x32xbf16>, vector<32x128xbf16>, vector<8x128xf32> -> vector<8x128xf32>
    %461 = arith.addf %460, %455 : vector<8x128xf32>
    %462 = math.tanh %458 : vector<8x128xf32>
    %cst_163 = arith.constant 5.000000e-01 : f32
    %463 = vector.broadcast %cst_163 : f32 to vector<8x128xf32>
    %464 = arith.mulf %463, %462 : vector<8x128xf32>
    %cst_164 = arith.constant 5.000000e-01 : f32
    %465 = vector.broadcast %cst_164 : f32 to vector<8x128xf32>
    %466 = arith.addf %464, %465 : vector<8x128xf32>
    %467 = arith.select %147, %462, %466 : vector<8x128xi1>, vector<8x128xf32>
    %468 = vector.extract_strided_slice %467 {offsets = [0, 0], sizes = [8, 32], strides = [1, 1]} : vector<8x128xf32> to vector<8x32xf32>
    %469 = vector.extract_strided_slice %467 {offsets = [0, 32], sizes = [8, 32], strides = [1, 1]} : vector<8x128xf32> to vector<8x32xf32>
    %470 = vector.extract_strided_slice %467 {offsets = [0, 64], sizes = [8, 32], strides = [1, 1]} : vector<8x128xf32> to vector<8x32xf32>
    %471 = vector.extract_strided_slice %467 {offsets = [0, 96], sizes = [8, 32], strides = [1, 1]} : vector<8x128xf32> to vector<8x32xf32>
    %472 = arith.mulf %469, %431 : vector<8x32xf32>
    %473 = arith.mulf %468, %470 : vector<8x32xf32>
    %474 = arith.addf %472, %473 : vector<8x32xf32>
    %475 = math.tanh %474 : vector<8x32xf32>
    %476 = arith.mulf %471, %475 : vector<8x32xf32>
    %477 = math.tanh %461 : vector<8x128xf32>
    %cst_165 = arith.constant 5.000000e-01 : f32
    %478 = vector.broadcast %cst_165 : f32 to vector<8x128xf32>
    %479 = arith.mulf %478, %477 : vector<8x128xf32>
    %cst_166 = arith.constant 5.000000e-01 : f32
    %480 = vector.broadcast %cst_166 : f32 to vector<8x128xf32>
    %481 = arith.addf %479, %480 : vector<8x128xf32>
    %482 = arith.select %147, %477, %481 : vector<8x128xi1>, vector<8x128xf32>
    %483 = vector.extract_strided_slice %482 {offsets = [0, 0], sizes = [8, 32], strides = [1, 1]} : vector<8x128xf32> to vector<8x32xf32>
    %484 = vector.extract_strided_slice %482 {offsets = [0, 32], sizes = [8, 32], strides = [1, 1]} : vector<8x128xf32> to vector<8x32xf32>
    %485 = vector.extract_strided_slice %482 {offsets = [0, 64], sizes = [8, 32], strides = [1, 1]} : vector<8x128xf32> to vector<8x32xf32>
    %486 = vector.extract_strided_slice %482 {offsets = [0, 96], sizes = [8, 32], strides = [1, 1]} : vector<8x128xf32> to vector<8x32xf32>
    %487 = arith.mulf %484, %446 : vector<8x32xf32>
    %488 = arith.mulf %483, %485 : vector<8x32xf32>
    %489 = arith.addf %487, %488 : vector<8x32xf32>
    %490 = math.tanh %489 : vector<8x32xf32>
    %491 = arith.mulf %486, %490 : vector<8x32xf32>
    %c8_i32_167 = arith.constant 8 : i32
    %492 = tpu.concatenate %476, %491, %474, %489 in 1 : vector<8x32xf32>, vector<8x32xf32>, vector<8x32xf32>, vector<8x32xf32> -> vector<8x128xf32>
    %c0_168 = arith.constant 0 : index
    %c0_169 = arith.constant 0 : index
    %493 = vector.load %arg9[%c0_168, %c0_169] : memref<8x128xf32, #tpu.memory_space<vmem>>, vector<8x128xf32>
    tpu.vector_store %arg9[%c0_168, %c0_169], %492 {strides = array<i32>} : memref<8x128xf32, #tpu.memory_space<vmem>>, vector<8x128xf32>,
    return
  }
  func.func @transform_0(%arg0: i32) -> (i32, i32) {
    %c0_i32 = arith.constant 0 : i32
    %c0_i32_0 = arith.constant 0 : i32
    return %arg0, %c0_i32 : i32, i32
  }
  func.func @transform_1(%arg0: i32) -> (i32, i32, i32) {
    %c0_i32 = arith.constant 0 : i32
    %c0_i32_0 = arith.constant 0 : i32
    %c0_i32_1 = arith.constant 0 : i32
    return %c0_i32, %arg0, %c0_i32_0 : i32, i32, i32
  }
  func.func @transform_2(%arg0: i32) -> (i32, i32) {
    %c0_i32 = arith.constant 0 : i32
    %c0_i32_0 = arith.constant 0 : i32
    %c0_i32_1 = arith.constant 0 : i32
    return %c0_i32, %c0_i32_0 : i32, i32
  }
  func.func @transform_3(%arg0: i32) -> (i32, i32) {
    %c0_i32 = arith.constant 0 : i32
    %c0_i32_0 = arith.constant 0 : i32
    %c0_i32_1 = arith.constant 0 : i32
    return %c0_i32, %c0_i32_0 : i32, i32
  }
  func.func @transform_4(%arg0: i32) -> (i32, i32) {
    %c0_i32 = arith.constant 0 : i32
    %c0_i32_0 = arith.constant 0 : i32
    %c0_i32_1 = arith.constant 0 : i32
    return %c0_i32, %c0_i32_0 : i32, i32
  }
  func.func @transform_5(%arg0: i32) -> (i32, i32) {
    %c0_i32 = arith.constant 0 : i32
    %c0_i32_0 = arith.constant 0 : i32
    %c0_i32_1 = arith.constant 0 : i32
    return %c0_i32, %c0_i32_0 : i32, i32
  }
  func.func @transform_6(%arg0: i32) -> (i32, i32) {
    %c0_i32 = arith.constant 0 : i32
    %c0_i32_0 = arith.constant 0 : i32
    %c0_i32_1 = arith.constant 0 : i32
    return %c0_i32, %c0_i32_0 : i32, i32
  }
  func.func @transform_7(%arg0: i32) -> (i32, i32) {
    %c0_i32 = arith.constant 0 : i32
    %c0_i32_0 = arith.constant 0 : i32
    %c0_i32_1 = arith.constant 0 : i32
    return %c0_i32, %c0_i32_0 : i32, i32
  }
  func.func @transform_8(%arg0: i32) -> (i32, i32) {
    %c0_i32 = arith.constant 0 : i32
    %c0_i32_0 = arith.constant 0 : i32
    return %arg0, %c0_i32 : i32, i32
  }
}

</mosaic_0001>

<bundles_post_ra>
// kernel: node_future_encoder.1
= control target key start
LH: loop header
LB: loop body
LE: loop exit
PB: predicated region body
PF: predicated region fallthrough
CT: control target
= control target key end

     0   :  { %v2046_v1 = vmov 0.0   ;;  %vm2047_vm0 = vmmov 0   ;;  %vm140_vm1 = vcmask 1042432   ;;  %v2048_v6 = vmov 0   ;;  %s2467_s0 = inlined_call_operand.vmem [shape: f32[8,32], index: 0, kind: input, shape index: {}]   ;;  %s2468_s1 = inlined_call_operand.vmem [shape: bf16[8,8,6], index: 1, kind: input, shape index: {}]   ;;  %s2469_s2 = inlined_call_operand.vmem [shape: bf16[6,256], index: 2, kind: input, shape index: {}]   ;;  %s2470_s3 = inlined_call_operand.vmem [shape: f32[1,256], index: 3, kind: input, shape index: {}]   ;;  %s2471_s4 = inlined_call_operand.vmem [shape: bf16[32,128], index: 4, kind: input, shape index: {}]   ;;  %s2472_s5 = inlined_call_operand.vmem [shape: bf16[32,128], index: 5, kind: input, shape index: {}]   ;;  %s2473_s6 = inlined_call_operand.vmem [shape: f32[32,64], index: 6, kind: input, shape index: {}]   ;;  %s2474_s7 = inlined_call_operand.vmem [shape: f32[1,64], index: 7, kind: input, shape index: {}]   ;;  %s2475_s8 = inlined_call_operand.hbm [shape: f32[8,128], index: 8, kind: output, shape index: {}]  }
   0x1   :  { %v35_v0 = vld [vmem:[%s2473_s6 + $0x18] sm:$0xff]  ;;  %1809 = vmatprep.subr.mxu0 %v2046_v1  ;;  %v34_v2 = vld [vmem:[%s2473_s6 + $0x10] sm:$0xff]  ;;  %1817 = vmatprep.mubr.msk.f32.mxu0 %vm2047_vm0, %v2046_v1  ;;  %v117_v3 = vld [vmem:[%s2469_s2] sm:$0x77]  ;;  %vm43_vm2 = vcmask 261120   ;;  %vm136_vm3 = vcmask 48128  }
   0x2   :  { %1810 = vmatpush3.msra.mxu0 %v35_v0  ;;  %v1713_v4 = vcombine.high %v117_v3, %v117_v3  ;;  %v1712_v5 = vcombine.low %v117_v3, %v117_v3  ;;  %179 = vmatprep.mubr.bf16.mxu1 %v2048_v6  ;;  %v33_v7 = vld [vmem:[%s2473_s6 + $0x8] sm:$0xff]  ;;  %v32_v8 = vld [vmem:[%s2473_s6] sm:$0xff] }
   0x3   :  { %1811 = vmatprep.subr.mxu0 %v2046_v1  ;;  %v119_v10 = vld [vmem:[%s2468_s1] sm:$0xf] }
   0x4   :  { %1812 = vmatpush3.msra.mxu0 %v34_v2  ;;  %1714 = vmatprep.subr.msk.bf16.mxu1 %vm140_vm1, %v1713_v4  ;;  %v142_v9 = vsel %vm140_vm1, %v1712_v5, 0  ;;  %v31_v11 = vld [vmem:[%s2467_s0] sm:$0xff] }
   0x5   :  { %1813 = vmatprep.subr.mxu0 %v2046_v1  ;;  %162 = vmatpush1.bf16.msra.mxu1 %v142_v9 }
   0x6   :  { %1814 = vmatpush3.msra.mxu0 %v33_v7  ;;  %1720 = vmatprep.subr.msk.bf16.mxu1 %vm140_vm1, %v1713_v4 }
   0x7   :  { %1815 = vmatprep.subr.mxu0 %v2046_v1 }
   0x8   :  { %1816 = vmatpush3.msra.mxu0 %v32_v8  ;;  %1715 = vmatmul.mubr.msk.bf16.vlgmr.msra.gmra.mxu1 %vm136_vm3, %v119_v10 }
   0x9   :  { %13 = vsyncpa [#allocation5], 0  ;;  %1818 = vmatmul.mubr.msk.f32.vlgmr.msra.gmra.mxu0 %vm43_vm2, %v31_v11  ;;  %1717 = vmatprep.subr.msk.bf16.mxu0 %vm140_vm1, %v1713_v4  ;;  %v1716_v12 = vld [vmem:[%s2468_s1 + $0x4] sm:$0xf]  ;;  %v1719_v13 = vld [vmem:[%s2468_s1 + $0x8] sm:$0xf]  ;;  %v121_v23 = vlaneseq }
   0xa   :  { %210 = vmatpush1.bf16.msra.mxu0 %v142_v9  ;;  %227 = vmatprep.mubr.bf16.mxu0 %v2048_v6  ;;  %v1722_v14 = vld [vmem:[%s2468_s1 + $0xc] sm:$0xf]  ;;  %v1725_v15 = vld [vmem:[%s2468_s1 + $0x10] sm:$0xf]  ;;  %v1728_v16 = vld [vmem:[%s2468_s1 + $0x14] sm:$0xf] }
   0xb   :  { %1723 = vmatprep.subr.msk.bf16.mxu0 %vm140_vm1, %v1713_v4  ;;  %260 = vmatpush1.bf16.msra.mxu1 %v142_v9  ;;  %v1731_v17 = vld [vmem:[%s2468_s1 + $0x18] sm:$0xf]  ;;  %v2169_v18 = vld [vmem:[%s2471_s4 + $0x8] sm:$0xff]   ;;  %v1734_v19 = vld [vmem:[%s2468_s1 + $0x1c] sm:$0xf]  ;;  %v122_v24 = vshrl.u32 %v121_v23, 7 }
   0xc   :  { %277 = vmatprep.mubr.bf16.mxu1 %v2048_v6  ;;  %1726 = vmatprep.subr.msk.bf16.mxu1 %vm140_vm1, %v1713_v4  ;;  %v2183_v20 = vld [vmem:[%s2472_s5 + $0x8] sm:$0xff]   ;;  %v2191_v21 = vld [vmem:[%s2472_s5] sm:$0xff]   ;;  %vm1691_vm7 = vcmask 523264   ;;  %vm1693_vm8 = vcmask 785408  }
   0xd   :  { %1718 = vmatmul.mubr.msk.bf16.vlgmr.msra.gmra.mxu0 %vm136_vm3, %v1716_v12  ;;  %v2208_v22 = vld [vmem:[%s2471_s4] sm:$0xff]   ;;  %v127_v25 = vsub.s32 1, %v122_v24  ;;  %v123_v29 = vsub.s32 0, %v122_v24  ;;  %s2050_s4 = smov 32  }
   0xe   :  { %310 = vmatpush1.bf16.msra.mxu0 %v142_v9  ;;  %327 = vmatprep.mubr.bf16.mxu0 %v2048_v6  ;;  %v118_v26 = vld [vmem:[%s2470_s3] sm:$0x3]  ;;  %s2049_s3 = smov 64  }
   0xf   :  { %1729 = vmatprep.subr.msk.bf16.mxu0 %vm140_vm1, %v1713_v4  ;;  %v1710_v27 = vld [vmem:[%s2474_s7] ss:$0 sm:$0xff]  ;;  %v128_v28 = vrot.slane %v118_v26, %v127_v25  ;;  %v124_v37 = vrot.slane %v118_v26, %v123_v29  ;;  %s2051_s7 = smov [#allocation4]  }
  0x10   :  { %1721 = vmatmul.mubr.msk.bf16.vlgmr.msra.gmra.mxu1 %vm136_vm3, %v1719_v13  ;;  %s1702_s17 = sshll.u32 %s2051_s7, 4  ;;  %s1703_s17 = int_to_ptr.vmem [resolvable:$true] %s1702_s17 }
  0x11   :  { %360 = vmatpush1.bf16.msra.mxu1 %v142_v9  ;;  %377 = vmatprep.mubr.bf16.mxu1 %v2048_v6  ;;  %s2024_s6 = scalar_lea.vmem %s1703_s17, 128  ;;  %p2029_p1 = scmp.lt.s32.totalorder %s1703_s17, %s1703_s17 }
  0x12   :  { %1732 = vmatprep.subr.msk.bf16.mxu1 %vm140_vm1, %v1713_v4  ;;  %p2025_p0 = scmp.ne.s32.totalorder %s1703_s17, %s2024_s6  ;;  %p2030_p2 = scmp.lt.s32.totalorder %s2024_s6, %s2024_s6 }
  0x14   :  { %p2031_p3 = por %p2030_p2, %p2029_p1 }
  0x15   :  { %1724 = vmatmul.mubr.msk.bf16.vlgmr.msra.gmra.mxu0 %vm136_vm3, %v1722_v14 }
  0x16   :  { %410 = vmatpush1.bf16.msra.mxu0 %v142_v9  ;;  %427 = vmatprep.mubr.bf16.mxu0 %v2048_v6  ;;  %p2032_p4 = pnand %p2031_p3, %p2025_p0 }
  0x17   :  { %1735 = vmatprep.subr.msk.bf16.mxu0 %vm140_vm1, %v1713_v4 }
  0x18   :  { %1727 = vmatmul.mubr.msk.bf16.vlgmr.msra.gmra.mxu1 %vm136_vm3, %v1725_v15 }
  0x19   :  { %460 = vmatpush1.bf16.msra.mxu1 %v142_v9  ;;  %477 = vmatprep.mubr.bf16.mxu1 %v2048_v6 }
  0x1a   :  { %1820 = vmatprep.subr.bf16.mxu1 %v2046_v1 }
  0x1d   :  { %1730 = vmatmul.mubr.msk.bf16.vlgmr.msra.gmra.mxu0 %vm136_vm3, %v1728_v16 }
  0x1e   :  { %510 = vmatpush1.bf16.msra.mxu0 %v142_v9  ;;  %527 = vmatprep.mubr.bf16.mxu0 %v2048_v6 }
  0x1f   :  { %1828 = vmatprep.subr.bf16.mxu0 %v2046_v1 }
  0x20   :  { %1733 = vmatmul.mubr.msk.bf16.vlgmr.msra.gmra.mxu1 %vm136_vm3, %v1731_v17 }
  0x21   :  { %1821 = vmatpush3.bf16.msra.mxu1 %v2169_v18  ;;  %1824 = vmatprep.mubr.msk.bf16.mxu1 %vm2047_vm0, %v2046_v1 }
  0x22   :  { %1822 = vmatprep.subr.bf16.mxu1 %v2046_v1 }
  0x25   :  { %1736 = vmatmul.mubr.msk.bf16.vlgmr.msra.gmra.mxu0 %vm136_vm3, %v1734_v19  ;;  %1823 = vmatpush3.bf16.msra.mxu1 %v2208_v22 }
  0x26   :  { %1829 = vmatpush3.bf16.msra.mxu0 %v2183_v20  ;;  %1832 = vmatprep.mubr.msk.bf16.mxu0 %vm2047_vm0, %v2046_v1 }
  0x27   :  { %1830 = vmatprep.subr.bf16.mxu0 %v2046_v1  ;;  %1836 = vmatprep.subr.bf16.mxu1 %v2046_v1 }
  0x2a   :  { %1831 = vmatpush3.bf16.msra.mxu0 %v2191_v21 }
  0x2b   :  { %1844 = vmatprep.subr.bf16.mxu0 %v2046_v1 }
  0x2d   :  { %1833 = vmatmul.mubr.bf16.vlgmr.msra.gmra.mxu0 %v2048_v6 }
  0x2e   :  { %1845 = vmatpush3.bf16.msra.mxu0 %v2183_v20  ;;  %1848 = vmatprep.mubr.msk.bf16.mxu0 %vm2047_vm0, %v2046_v1 }
  0x2f   :  { %1846 = vmatprep.subr.bf16.mxu0 %v2046_v1 }
  0x32   :  { %1847 = vmatpush3.bf16.msra.mxu0 %v2191_v21 }
  0x33   :  { %1860 = vmatprep.subr.bf16.mxu0 %v2046_v1 }
  0xc8   :  { %v2219_v30 = vpop.f32.mrf.mxu1 }
  0xc9   :  { %v113_v31 = vpop.f32.mrf.mxu0 }
  0xca   :  { %v2221_v32 = vadd.f32 %v1710_v27, %v113_v31  ;;  %v183_v33 = vpop.f32.mrf.mxu1  ;;  %v182_v31 = vadd.f32 %v2219_v30, %v124_v37 }
  0xcb   :  { %v1819_v34 = vpop.f32.mrf.mxu0  ;;  %v2223_v35 = vadd.f32 %v183_v33, %v128_v28 }
  0xcc   :  { %v555_v36 = vpack.c.bf16 %v2221_v32, %v2221_v32  ;;  %v185_v38 = vpop.f32.mrf.mxu1 }
  0xcd   :  { %v229_v39 = vpop.f32.mrf.mxu0 }
  0xce   :  { %1825 = vmatmul.mubr.msk.bf16.vlgmr.msra.gmra.mxu1 %vm43_vm2, %v555_v36  ;;  %v2228_v40 = vadd.f32 %v229_v39, %v124_v37  ;;  %v186_v41 = vpop.f32.mrf.mxu1 }
  0xcf   :  { %v231_v42 = vpop.f32.mrf.mxu0  ;;  %1837 = vmatpush3.bf16.msra.mxu1 %v2169_v18  ;;  %1840 = vmatprep.mubr.msk.bf16.mxu1 %vm2047_vm0, %v2046_v1  ;;  %v549_v41 = vand.u32 127, %v121_v23 }
  0xd0   :  { %v2233_v43 = vadd.f32 %v231_v42, %v128_v28  ;;  %v279_v44 = vpop.f32.mrf.mxu1  ;;  %1838 = vmatprep.subr.bf16.mxu1 %v2046_v1 }
  0xd1   :  { %v233_v45 = vpop.f32.mrf.mxu0  ;;  %v2236_v46 = vadd.f32 %v279_v44, %v124_v37  ;;  %vm550_vm4 = vcmp.ge.s32.totalorder %v549_v41, 64  ;;  %vm551_vm5 = vcmp.lt.s32.totalorder %v549_v41, 96 }
  0xd2   :  { %v281_v47 = vpop.f32.mrf.mxu1  ;;  %vm2262_vm6 = vmand %vm550_vm4, %vm551_vm5 }
  0xd3   :  { %v234_v48 = vpop.f32.mrf.mxu0  ;;  %v2238_v49 = vadd.f32 %v281_v47, %v128_v28  ;;  %1839 = vmatpush3.bf16.msra.mxu1 %v2208_v22 }
  0xd4   :  { %v283_v50 = vpop.f32.mrf.mxu1  ;;  %1852 = vmatprep.subr.bf16.mxu1 %v2046_v1 }
  0xd5   :  { %v329_v51 = vpop.f32.mrf.mxu0 }
  0xd6   :  { %v2242_v52 = vadd.f32 %v329_v51, %v124_v37  ;;  %v284_v53 = vpop.f32.mrf.mxu1 }
  0xd7   :  { %v331_v54 = vpop.f32.mrf.mxu0 }
  0xd8   :  { %v2244_v55 = vadd.f32 %v331_v54, %v128_v28  ;;  %v379_v56 = vpop.f32.mrf.mxu1 }
  0xd9   :  { %v333_v57 = vpop.f32.mrf.mxu0  ;;  %v2246_v58 = vadd.f32 %v379_v56, %v124_v37 }
  0xda   :  { %v381_v59 = vpop.f32.mrf.mxu1 }
  0xdb   :  { %v334_v60 = vpop.f32.mrf.mxu0  ;;  %v2248_v61 = vadd.f32 %v381_v59, %v128_v28 }
  0xdc   :  { %v383_v62 = vpop.f32.mrf.mxu1 }
  0xdd   :  { %v429_v63 = vpop.f32.mrf.mxu0 }
  0xde   :  { %v2250_v0 = vadd.f32 %v429_v63, %v124_v37  ;;  %v384_v2 = vpop.f32.mrf.mxu1 }
  0xdf   :  { %v431_v3 = vpop.f32.mrf.mxu0 }
  0xe0   :  { %v2252_v4 = vadd.f32 %v431_v3, %v128_v28  ;;  %v479_v5 = vpop.f32.mrf.mxu1 }
  0xe1   :  { %v433_v6 = vpop.f32.mrf.mxu0  ;;  %v2254_v7 = vadd.f32 %v479_v5, %v124_v37 }
  0xe2   :  { %v481_v8 = vpop.f32.mrf.mxu1 }
  0xe3   :  { %v434_v9 = vpop.f32.mrf.mxu0  ;;  %v2256_v10 = vadd.f32 %v481_v8, %v128_v28 }
  0xe4   :  { %v483_v11 = vpop.f32.mrf.mxu1 }
  0xe5   :  { %v529_v12 = vpop.f32.mrf.mxu0 }
  0xe6   :  { %v2258_v13 = vadd.f32 %v529_v12, %v124_v37  ;;  %v484_v14 = vpop.f32.mrf.mxu1 }
  0xe7   :  { %v531_v15 = vpop.f32.mrf.mxu0 }
  0xe8   :  { %v532_v17 = vadd.f32 %v531_v15, %v128_v28 }
  0xe9   :  { %v533_v16 = vpop.f32.mrf.mxu0 }
  0xeb   :  { %v534_v19 = vpop.f32.mrf.mxu0 }
  0xed   :  { %v660_v24 = vpop.f32.mrf.mxu0 }
  0xee   :  { %v661_v25 = vadd.f32 %v660_v24, %v532_v17 }
  0xef   :  { %v1834_v26 = vpop.f32.mrf.mxu0 }
  0xf0   :  { %1960 = vtanh.f32 %v661_v25 }
  0xf1   :  { %v663_v27 = vpop.f32.mrf.mxu0 }
  0xf3   :  { %v1835_v29 = vpop.f32.mrf.mxu0 }
  0xfd   :  { %v1961_v42 = vpop.eup %1960 }
  0xfe   :  { %v688_v45 = vmul.f32 0.5, %v1961_v42 }
 0x100   :  { %v689_v37 = vadd.f32 0.5, %v688_v45 }
 0x102   :  { %v690_v23 = vsel %vm2262_vm6, %v1961_v42, %v689_v37 }
 0x103   :  { %v691_v60 = vmul.f32 0.0, %v690_v23 }
 0x18e   :  { %v605_v33 = vpop.f32.mrf.mxu1 }
 0x18f   :  { %v606_v34 = vadd.f32 %v605_v33, %v182_v31 }
 0x190   :  { %v1826_v36 = vpop.f32.mrf.mxu1 }
 0x191   :  { %1962 = vtanh.f32 %v606_v34 }
 0x192   :  { %v608_v38 = vpop.f32.mrf.mxu1 }
 0x194   :  { %v1827_v39 = vpop.f32.mrf.mxu1 }
 0x19e   :  { %v1963_v44 = vpop.eup %1962 }
 0x19f   :  { %v667_v28 = vmul.f32 0.5, %v1963_v44 }
 0x1a1   :  { %v668_v47 = vadd.f32 0.5, %v667_v28 }
 0x1a3   :  { %v669_v30 = vsel %vm2262_vm6, %v1963_v44, %v668_v47 }
 0x1a4   :  { %672 = vrot.lane.b32.xlu0 %v669_v30, %s2049_s3  ;;  %v670_v56 = vmul.f32 %v669_v30, %v2221_v32 }
 0x1a8   :  { %693 = vrot.lane.b32.xlu0 %v690_v23, %s2049_s3 }
 0x216   :  { %v673_v50 = vpop.permute.xlu0 %672 }
 0x217   :  { %v675_v51 = vmul.f32 %v673_v50, %v669_v30 }
 0x219   :  { %677 = vrot.lane.b32.xlu1 %v675_v51, %s2050_s4 }
 0x21a   :  { %v694_v53 = vpop.permute.xlu0 %693 }
 0x21b   :  { %v696_v54 = vmul.f32 %v694_v53, %v690_v23 }
 0x21d   :  { %698 = vrot.lane.b32.xlu1 %v696_v54, %s2050_s4 }
 0x28b   :  { %v678_v57 = vpop.permute.xlu1 %677 }
 0x28c   :  { %v680_v59 = vadd.f32 %v678_v57, %v670_v56 }
 0x28e   :  { %1964 = vtanh.f32 %v680_v59 }
 0x28f   :  { %v699_v62 = vpop.permute.xlu1 %698 }
 0x290   :  { %v701_v63 = vadd.f32 %v699_v62, %v691_v60 }
 0x292   :  { %1966 = vtanh.f32 %v701_v63 }
 0x29b   :  { %v1965_v2 = vpop.eup %1964 }
 0x29c   :  { %683 = vrot.lane.b32.xlu0 %v1965_v2, %s2049_s3 }
 0x29f   :  { %v1967_v3 = vpop.eup %1966 }
 0x2a0   :  { %704 = vrot.lane.b32.xlu1 %v1967_v3, %s2049_s3 }
 0x30e   :  { %v684_v5 = vpop.permute.xlu0 %683 }
 0x30f   :  { %v686_v6 = vmul.f32 %v684_v5, %v669_v30 }
 0x311   :  { %v710_v8 = vpack.c.bf16 %v686_v6, %v686_v6 }
 0x312   :  { %v705_v9 = vpop.permute.xlu1 %704 }
 0x313   :  { %v707_v11 = vmul.f32 %v705_v9, %v690_v23  ;;  %712 = vrot.lane.b32.xlu0 %v710_v8, %s2050_s4 }
 0x315   :  { %v757_v32 = vpack.c.bf16 %v707_v11, %v707_v11 }
 0x317   :  { %759 = vrot.lane.b32.xlu1 %v757_v32, %s2050_s4 }
 0x385   :  { %v713_v12 = vpop.permute.xlu0 %712 }
 0x386   :  { %1841 = vmatmul.mubr.msk.bf16.vlgmr.msra.gmra.mxu1 %vm43_vm2, %v713_v12 }
 0x387   :  { %1853 = vmatpush3.bf16.msra.mxu1 %v2169_v18  ;;  %1856 = vmatprep.mubr.msk.bf16.mxu1 %vm2047_vm0, %v2046_v1 }
 0x388   :  { %1854 = vmatprep.subr.bf16.mxu1 %v2046_v1 }
 0x389   :  { %v760_v14 = vpop.permute.xlu1 %759 }
 0x38a   :  { %1849 = vmatmul.mubr.msk.bf16.vlgmr.msra.gmra.mxu0 %vm43_vm2, %v760_v14 }
 0x38b   :  { %1861 = vmatpush3.bf16.msra.mxu0 %v2183_v20  ;;  %1855 = vmatpush3.bf16.msra.mxu1 %v2208_v22 }
 0x38c   :  { %1862 = vmatprep.subr.bf16.mxu0 %v2046_v1  ;;  %1864 = vmatprep.mubr.msk.bf16.mxu0 %vm2047_vm0, %v2046_v1 }
 0x38d   :  { %1868 = vmatprep.subr.bf16.mxu1 %v2046_v1 }
 0x38f   :  { %1863 = vmatpush3.bf16.msra.mxu0 %v2191_v21 }
 0x390   :  { %1876 = vmatprep.subr.bf16.mxu0 %v2046_v1 }
 0x446   :  { %v751_v15 = vpop.f32.mrf.mxu1 }
 0x447   :  { %v752_v16 = vadd.f32 %v751_v15, %v2228_v40 }
 0x448   :  { %v1842_v17 = vpop.f32.mrf.mxu1 }
 0x449   :  { %1968 = vtanh.f32 %v752_v16 }
 0x44a   :  { %v754_v19 = vpop.f32.mrf.mxu1  ;;  %v798_v24 = vpop.f32.mrf.mxu0 }
 0x44b   :  { %v799_v25 = vadd.f32 %v798_v24, %v2256_v10 }
 0x44c   :  { %v1843_v26 = vpop.f32.mrf.mxu1  ;;  %v1850_v27 = vpop.f32.mrf.mxu0 }
 0x44d   :  { %1970 = vtanh.f32 %v799_v25 }
 0x44e   :  { %v801_v29 = vpop.f32.mrf.mxu0 }
 0x450   :  { %v1851_v31 = vpop.f32.mrf.mxu0 }
 0x456   :  { %v1969_v33 = vpop.eup %1968 }
 0x457   :  { %v805_v34 = vmul.f32 0.5, %v1969_v33 }
 0x459   :  { %v806_v36 = vadd.f32 0.5, %v805_v34 }
 0x45a   :  { %v1971_v38 = vpop.eup %1970 }
 0x45b   :  { %v807_v39 = vsel %vm2262_vm6, %v1969_v33, %v806_v36  ;;  %v826_v41 = vmul.f32 0.5, %v1971_v38 }
 0x45c   :  { %810 = vrot.lane.b32.xlu0 %v807_v39, %s2049_s3  ;;  %v808_v47 = vmul.f32 %v807_v39, %v680_v59 }
 0x45d   :  { %v827_v40 = vadd.f32 0.5, %v826_v41 }
 0x45f   :  { %v828_v42 = vsel %vm2262_vm6, %v1971_v38, %v827_v40 }
 0x460   :  { %831 = vrot.lane.b32.xlu1 %v828_v42, %s2049_s3  ;;  %v829_v23 = vmul.f32 %v828_v42, %v701_v63 }
 0x4ce   :  { %v811_v10 = vpop.permute.xlu0 %810 }
 0x4cf   :  { %v813_v44 = vmul.f32 %v811_v10, %v807_v39 }
 0x4d1   :  { %815 = vrot.lane.b32.xlu0 %v813_v44, %s2050_s4 }
 0x4d2   :  { %v832_v28 = vpop.permute.xlu1 %831 }
 0x4d3   :  { %v834_v45 = vmul.f32 %v832_v28, %v828_v42 }
 0x4d5   :  { %836 = vrot.lane.b32.xlu1 %v834_v45, %s2050_s4 }
 0x543   :  { %v816_v30 = vpop.permute.xlu0 %815 }
 0x544   :  { %v818_v37 = vadd.f32 %v816_v30, %v808_v47 }
 0x546   :  { %1972 = vtanh.f32 %v818_v37 }
 0x547   :  { %v837_v50 = vpop.permute.xlu1 %836 }
 0x548   :  { %v839_v51 = vadd.f32 %v837_v50, %v829_v23 }
 0x54a   :  { %1974 = vtanh.f32 %v839_v51 }
 0x553   :  { %v1973_v53 = vpop.eup %1972 }
 0x554   :  { %821 = vrot.lane.b32.xlu0 %v1973_v53, %s2049_s3 }
 0x557   :  { %v1975_v54 = vpop.eup %1974 }
 0x558   :  { %842 = vrot.lane.b32.xlu1 %v1975_v54, %s2049_s3 }
 0x5c6   :  { %v822_v56 = vpop.permute.xlu0 %821 }
 0x5c7   :  { %v824_v57 = vmul.f32 %v822_v56, %v807_v39 }
 0x5c9   :  { %v848_v60 = vpack.c.bf16 %v824_v57, %v824_v57 }
 0x5ca   :  { %v843_v62 = vpop.permute.xlu1 %842 }
 0x5cb   :  { %v845_v2 = vmul.f32 %v843_v62, %v828_v42  ;;  %850 = vrot.lane.b32.xlu0 %v848_v60, %s2050_s4 }
 0x5cd   :  { %v895_v59 = vpack.c.bf16 %v845_v2, %v845_v2 }
 0x5cf   :  { %897 = vrot.lane.b32.xlu1 %v895_v59, %s2050_s4 }
 0x63d   :  { %v851_v63 = vpop.permute.xlu0 %850 }
 0x63e   :  { %1857 = vmatmul.mubr.msk.bf16.vlgmr.msra.gmra.mxu1 %vm43_vm2, %v851_v63 }
 0x63f   :  { %1869 = vmatpush3.bf16.msra.mxu1 %v2169_v18  ;;  %1872 = vmatprep.mubr.msk.bf16.mxu1 %vm2047_vm0, %v2046_v1 }
 0x640   :  { %1870 = vmatprep.subr.bf16.mxu1 %v2046_v1 }
 0x641   :  { %v898_v3 = vpop.permute.xlu1 %897 }
 0x642   :  { %1865 = vmatmul.mubr.msk.bf16.vlgmr.msra.gmra.mxu0 %vm43_vm2, %v898_v3 }
 0x643   :  { %1877 = vmatpush3.bf16.msra.mxu0 %v2183_v20  ;;  %1871 = vmatpush3.bf16.msra.mxu1 %v2208_v22 }
 0x644   :  { %1878 = vmatprep.subr.bf16.mxu0 %v2046_v1  ;;  %1880 = vmatprep.mubr.msk.bf16.mxu0 %vm2047_vm0, %v2046_v1 }
 0x645   :  { %1884 = vmatprep.subr.bf16.mxu1 %v2046_v1 }
 0x647   :  { %1879 = vmatpush3.bf16.msra.mxu0 %v2191_v21 }
 0x648   :  { %1892 = vmatprep.subr.bf16.mxu0 %v2046_v1 }
 0x6fe   :  { %v889_v5 = vpop.f32.mrf.mxu1 }
 0x6ff   :  { %v890_v6 = vadd.f32 %v889_v5, %v2236_v46 }
 0x700   :  { %v1858_v8 = vpop.f32.mrf.mxu1 }
 0x701   :  { %1976 = vtanh.f32 %v890_v6 }
 0x702   :  { %v892_v9 = vpop.f32.mrf.mxu1  ;;  %v936_v11 = vpop.f32.mrf.mxu0 }
 0x703   :  { %v937_v32 = vadd.f32 %v936_v11, %v2252_v4 }
 0x704   :  { %v1859_v12 = vpop.f32.mrf.mxu1  ;;  %v1866_v14 = vpop.f32.mrf.mxu0 }
 0x705   :  { %1978 = vtanh.f32 %v937_v32 }
 0x706   :  { %v939_v15 = vpop.f32.mrf.mxu0 }
 0x708   :  { %v1867_v16 = vpop.f32.mrf.mxu0 }
 0x70e   :  { %v1977_v17 = vpop.eup %1976 }
 0x70f   :  { %v943_v19 = vmul.f32 0.5, %v1977_v17 }
 0x711   :  { %v944_v24 = vadd.f32 0.5, %v943_v19 }
 0x712   :  { %v1979_v25 = vpop.eup %1978 }
 0x713   :  { %v945_v26 = vsel %vm2262_vm6, %v1977_v17, %v944_v24  ;;  %v964_v27 = vmul.f32 0.5, %v1979_v25 }
 0x714   :  { %948 = vrot.lane.b32.xlu0 %v945_v26, %s2049_s3  ;;  %v946_v36 = vmul.f32 %v945_v26, %v818_v37 }
 0x715   :  { %v965_v46 = vadd.f32 0.5, %v964_v27 }
 0x717   :  { %v966_v29 = vsel %vm2262_vm6, %v1979_v25, %v965_v46 }
 0x718   :  { %969 = vrot.lane.b32.xlu1 %v966_v29, %s2049_s3  ;;  %v967_v41 = vmul.f32 %v966_v29, %v839_v51 }
 0x786   :  { %v949_v4 = vpop.permute.xlu0 %948 }
 0x787   :  { %v951_v31 = vmul.f32 %v949_v4, %v945_v26 }
 0x789   :  { %953 = vrot.lane.b32.xlu0 %v951_v31, %s2050_s4 }
 0x78a   :  { %v970_v33 = vpop.permute.xlu1 %969 }
 0x78b   :  { %v972_v34 = vmul.f32 %v970_v33, %v966_v29 }
 0x78d   :  { %974 = vrot.lane.b32.xlu1 %v972_v34, %s2050_s4 }
 0x7fb   :  { %v954_v38 = vpop.permute.xlu0 %953 }
 0x7fc   :  { %v956_v39 = vadd.f32 %v954_v38, %v946_v36 }
 0x7fe   :  { %1980 = vtanh.f32 %v956_v39 }
 0x7ff   :  { %v975_v40 = vpop.permute.xlu1 %974 }
 0x800   :  { %v977_v42 = vadd.f32 %v975_v40, %v967_v41 }
 0x802   :  { %1982 = vtanh.f32 %v977_v42 }
 0x80b   :  { %v1981_v10 = vpop.eup %1980 }
 0x80c   :  { %959 = vrot.lane.b32.xlu0 %v1981_v10, %s2049_s3 }
 0x80f   :  { %v1983_v44 = vpop.eup %1982 }
 0x810   :  { %980 = vrot.lane.b32.xlu1 %v1983_v44, %s2049_s3 }
 0x87e   :  { %v960_v28 = vpop.permute.xlu0 %959 }
 0x87f   :  { %v962_v45 = vmul.f32 %v960_v28, %v945_v26 }
 0x881   :  { %v986_v47 = vpack.c.bf16 %v962_v45, %v962_v45 }
 0x882   :  { %v981_v30 = vpop.permute.xlu1 %980 }
 0x883   :  { %v983_v23 = vmul.f32 %v981_v30, %v966_v29  ;;  %988 = vrot.lane.b32.xlu0 %v986_v47, %s2050_s4 }
 0x885   :  { %v1033_v37 = vpack.c.bf16 %v983_v23, %v983_v23 }
 0x887   :  { %1035 = vrot.lane.b32.xlu1 %v1033_v37, %s2050_s4 }
 0x8f5   :  { %v989_v50 = vpop.permute.xlu0 %988 }
 0x8f6   :  { %1873 = vmatmul.mubr.msk.bf16.vlgmr.msra.gmra.mxu1 %vm43_vm2, %v989_v50 }
 0x8f7   :  { %1885 = vmatpush3.bf16.msra.mxu1 %v2169_v18  ;;  %1888 = vmatprep.mubr.msk.bf16.mxu1 %vm2047_vm0, %v2046_v1 }
 0x8f8   :  { %1886 = vmatprep.subr.bf16.mxu1 %v2046_v1 }
 0x8f9   :  { %v1036_v51 = vpop.permute.xlu1 %1035 }
 0x8fa   :  { %1881 = vmatmul.mubr.msk.bf16.vlgmr.msra.gmra.mxu0 %vm43_vm2, %v1036_v51 }
 0x8fb   :  { %1893 = vmatpush3.bf16.msra.mxu0 %v2183_v20  ;;  %1887 = vmatpush3.bf16.msra.mxu1 %v2208_v22 }
 0x8fc   :  { %1894 = vmatprep.subr.bf16.mxu0 %v2046_v1  ;;  %1896 = vmatprep.mubr.msk.bf16.mxu0 %vm2047_vm0, %v2046_v1 }
 0x8fd   :  { %1900 = vmatprep.subr.bf16.mxu1 %v2046_v1 }
 0x8ff   :  { %1895 = vmatpush3.bf16.msra.mxu0 %v2191_v21 }
 0x900   :  { %1908 = vmatprep.subr.bf16.mxu0 %v2046_v1 }
 0x9b6   :  { %v1027_v53 = vpop.f32.mrf.mxu1 }
 0x9b7   :  { %v1028_v54 = vadd.f32 %v1027_v53, %v2242_v52 }
 0x9b8   :  { %v1874_v56 = vpop.f32.mrf.mxu1 }
 0x9b9   :  { %1984 = vtanh.f32 %v1028_v54 }
 0x9ba   :  { %v1030_v57 = vpop.f32.mrf.mxu1  ;;  %v1074_v60 = vpop.f32.mrf.mxu0 }
 0x9bb   :  { %v1075_v62 = vadd.f32 %v1074_v60, %v2248_v61 }
 0x9bc   :  { %v1875_v2 = vpop.f32.mrf.mxu1  ;;  %v1882_v59 = vpop.f32.mrf.mxu0 }
 0x9bd   :  { %1986 = vtanh.f32 %v1075_v62 }
 0x9be   :  { %v1077_v63 = vpop.f32.mrf.mxu0 }
 0x9c0   :  { %v1883_v3 = vpop.f32.mrf.mxu0 }
 0x9c6   :  { %v1985_v5 = vpop.eup %1984 }
 0x9c7   :  { %v1081_v6 = vmul.f32 0.5, %v1985_v5 }
 0x9c9   :  { %v1082_v8 = vadd.f32 0.5, %v1081_v6 }
 0x9ca   :  { %v1987_v9 = vpop.eup %1986 }
 0x9cb   :  { %v1083_v11 = vsel %vm2262_vm6, %v1985_v5, %v1082_v8  ;;  %v1102_v32 = vmul.f32 0.5, %v1987_v9 }
 0x9cc   :  { %1086 = vrot.lane.b32.xlu0 %v1083_v11, %s2049_s3  ;;  %v1084_v17 = vmul.f32 %v1083_v11, %v956_v39 }
 0x9cd   :  { %v1103_v52 = vadd.f32 0.5, %v1102_v32 }
 0x9cf   :  { %v1104_v12 = vsel %vm2262_vm6, %v1987_v9, %v1103_v52 }
 0x9d0   :  { %1107 = vrot.lane.b32.xlu1 %v1104_v12, %s2049_s3  ;;  %v1105_v25 = vmul.f32 %v1104_v12, %v977_v42 }
 0xa3e   :  { %v1087_v61 = vpop.permute.xlu0 %1086 }
 0xa3f   :  { %v1089_v14 = vmul.f32 %v1087_v61, %v1083_v11 }
 0xa41   :  { %1091 = vrot.lane.b32.xlu0 %v1089_v14, %s2050_s4 }
 0xa42   :  { %v1108_v15 = vpop.permute.xlu1 %1107 }
 0xa43   :  { %v1110_v16 = vmul.f32 %v1108_v15, %v1104_v12 }
 0xa45   :  { %1112 = vrot.lane.b32.xlu1 %v1110_v16, %s2050_s4 }
 0xab3   :  { %v1092_v19 = vpop.permute.xlu0 %1091 }
 0xab4   :  { %v1094_v24 = vadd.f32 %v1092_v19, %v1084_v17 }
 0xab6   :  { %1988 = vtanh.f32 %v1094_v24 }
 0xab7   :  { %v1113_v26 = vpop.permute.xlu1 %1112 }
 0xab8   :  { %v1115_v27 = vadd.f32 %v1113_v26, %v1105_v25 }
 0xaba   :  { %1990 = vtanh.f32 %v1115_v27 }
 0xac3   :  { %v1989_v46 = vpop.eup %1988 }
 0xac4   :  { %1097 = vrot.lane.b32.xlu0 %v1989_v46, %s2049_s3 }
 0xac7   :  { %v1991_v29 = vpop.eup %1990 }
 0xac8   :  { %1118 = vrot.lane.b32.xlu1 %v1991_v29, %s2049_s3 }
 0xb36   :  { %v1098_v4 = vpop.permute.xlu0 %1097 }
 0xb37   :  { %v1100_v31 = vmul.f32 %v1098_v4, %v1083_v11 }
 0xb39   :  { %v1124_v33 = vpack.c.bf16 %v1100_v31, %v1100_v31 }
 0xb3a   :  { %v1119_v34 = vpop.permute.xlu1 %1118 }
 0xb3b   :  { %v1121_v36 = vmul.f32 %v1119_v34, %v1104_v12  ;;  %1126 = vrot.lane.b32.xlu0 %v1124_v33, %s2050_s4 }
 0xb3d   :  { %v1171_v38 = vpack.c.bf16 %v1121_v36, %v1121_v36 }
 0xb3f   :  { %1173 = vrot.lane.b32.xlu1 %v1171_v38, %s2050_s4 }
 0xbad   :  { %v1127_v39 = vpop.permute.xlu0 %1126 }
 0xbae   :  { %1889 = vmatmul.mubr.msk.bf16.vlgmr.msra.gmra.mxu1 %vm43_vm2, %v1127_v39 }
 0xbaf   :  { %1901 = vmatpush3.bf16.msra.mxu1 %v2169_v18  ;;  %1904 = vmatprep.mubr.msk.bf16.mxu1 %vm2047_vm0, %v2046_v1 }
 0xbb0   :  { %1902 = vmatprep.subr.bf16.mxu1 %v2046_v1 }
 0xbb1   :  { %v1174_v41 = vpop.permute.xlu1 %1173 }
 0xbb2   :  { %1897 = vmatmul.mubr.msk.bf16.vlgmr.msra.gmra.mxu0 %vm43_vm2, %v1174_v41 }
 0xbb3   :  { %1909 = vmatpush3.bf16.msra.mxu0 %v2183_v20  ;;  %1903 = vmatpush3.bf16.msra.mxu1 %v2208_v22 }
 0xbb4   :  { %1910 = vmatprep.subr.bf16.mxu0 %v2046_v1  ;;  %1912 = vmatprep.mubr.msk.bf16.mxu0 %vm2047_vm0, %v2046_v1 }
 0xbb5   :  { %1916 = vmatprep.subr.bf16.mxu1 %v2046_v1 }
 0xbb7   :  { %1911 = vmatpush3.bf16.msra.mxu0 %v2191_v21 }
 0xbb8   :  { %1924 = vmatprep.subr.bf16.mxu0 %v2046_v1 }
 0xc6e   :  { %v1165_v40 = vpop.f32.mrf.mxu1 }
 0xc6f   :  { %v1166_v42 = vadd.f32 %v1165_v40, %v2246_v58 }
 0xc70   :  { %v1890_v10 = vpop.f32.mrf.mxu1 }
 0xc71   :  { %1992 = vtanh.f32 %v1166_v42 }
 0xc72   :  { %v1168_v44 = vpop.f32.mrf.mxu1  ;;  %v1212_v28 = vpop.f32.mrf.mxu0 }
 0xc73   :  { %v1213_v45 = vadd.f32 %v1212_v28, %v2244_v55 }
 0xc74   :  { %v1891_v47 = vpop.f32.mrf.mxu1  ;;  %v1898_v30 = vpop.f32.mrf.mxu0 }
 0xc75   :  { %1994 = vtanh.f32 %v1213_v45 }
 0xc76   :  { %v1215_v23 = vpop.f32.mrf.mxu0 }
 0xc78   :  { %v1899_v37 = vpop.f32.mrf.mxu0 }
 0xc7e   :  { %v1993_v50 = vpop.eup %1992 }
 0xc7f   :  { %v1219_v51 = vmul.f32 0.5, %v1993_v50 }
 0xc81   :  { %v1220_v53 = vadd.f32 0.5, %v1219_v51 }
 0xc82   :  { %v1995_v54 = vpop.eup %1994 }
 0xc83   :  { %v1221_v56 = vsel %vm2262_vm6, %v1993_v50, %v1220_v53  ;;  %v1240_v57 = vmul.f32 0.5, %v1995_v54 }
 0xc84   :  { %1224 = vrot.lane.b32.xlu0 %v1221_v56, %s2049_s3  ;;  %v1222_v63 = vmul.f32 %v1221_v56, %v1094_v24 }
 0xc85   :  { %v1241_v58 = vadd.f32 0.5, %v1240_v57 }
 0xc87   :  { %v1242_v60 = vsel %vm2262_vm6, %v1995_v54, %v1241_v58 }
 0xc88   :  { %1245 = vrot.lane.b32.xlu1 %v1242_v60, %s2049_s3  ;;  %v1243_v6 = vmul.f32 %v1242_v60, %v1115_v27 }
 0xcf6   :  { %v1225_v55 = vpop.permute.xlu0 %1224 }
 0xcf7   :  { %v1227_v62 = vmul.f32 %v1225_v55, %v1221_v56 }
 0xcf9   :  { %1229 = vrot.lane.b32.xlu0 %v1227_v62, %s2050_s4 }
 0xcfa   :  { %v1246_v2 = vpop.permute.xlu1 %1245 }
 0xcfb   :  { %v1248_v59 = vmul.f32 %v1246_v2, %v1242_v60 }
 0xcfd   :  { %1250 = vrot.lane.b32.xlu1 %v1248_v59, %s2050_s4 }
 0xd6b   :  { %v1230_v3 = vpop.permute.xlu0 %1229 }
 0xd6c   :  { %v1232_v5 = vadd.f32 %v1230_v3, %v1222_v63 }
 0xd6e   :  { %1996 = vtanh.f32 %v1232_v5 }
 0xd6f   :  { %v1251_v8 = vpop.permute.xlu1 %1250 }
 0xd70   :  { %v1253_v9 = vadd.f32 %v1251_v8, %v1243_v6 }
 0xd72   :  { %1998 = vtanh.f32 %v1253_v9 }
 0xd7b   :  { %v1997_v11 = vpop.eup %1996 }
 0xd7c   :  { %1235 = vrot.lane.b32.xlu0 %v1997_v11, %s2049_s3 }
 0xd7f   :  { %v1999_v32 = vpop.eup %1998 }
 0xd80   :  { %1256 = vrot.lane.b32.xlu1 %v1999_v32, %s2049_s3 }
 0xdee   :  { %v1236_v52 = vpop.permute.xlu0 %1235 }
 0xdef   :  { %v1238_v12 = vmul.f32 %v1236_v52, %v1221_v56 }
 0xdf1   :  { %v1262_v61 = vpack.c.bf16 %v1238_v12, %v1238_v12 }
 0xdf2   :  { %v1257_v14 = vpop.permute.xlu1 %1256 }
 0xdf3   :  { %v1259_v15 = vmul.f32 %v1257_v14, %v1242_v60  ;;  %1264 = vrot.lane.b32.xlu0 %v1262_v61, %s2050_s4 }
 0xdf5   :  { %v1309_v16 = vpack.c.bf16 %v1259_v15, %v1259_v15 }
 0xdf7   :  { %1311 = vrot.lane.b32.xlu1 %v1309_v16, %s2050_s4 }
 0xe65   :  { %v1265_v17 = vpop.permute.xlu0 %1264 }
 0xe66   :  { %1905 = vmatmul.mubr.msk.bf16.vlgmr.msra.gmra.mxu1 %vm43_vm2, %v1265_v17 }
 0xe67   :  { %1917 = vmatpush3.bf16.msra.mxu1 %v2169_v18  ;;  %1920 = vmatprep.mubr.msk.bf16.mxu1 %vm2047_vm0, %v2046_v1 }
 0xe68   :  { %1918 = vmatprep.subr.bf16.mxu1 %v2046_v1 }
 0xe69   :  { %v1312_v19 = vpop.permute.xlu1 %1311 }
 0xe6a   :  { %1913 = vmatmul.mubr.msk.bf16.vlgmr.msra.gmra.mxu0 %vm43_vm2, %v1312_v19 }
 0xe6b   :  { %1925 = vmatpush3.bf16.msra.mxu0 %v2183_v20  ;;  %1919 = vmatpush3.bf16.msra.mxu1 %v2208_v22 }
 0xe6c   :  { %1926 = vmatprep.subr.bf16.mxu0 %v2046_v1  ;;  %1928 = vmatprep.mubr.msk.bf16.mxu0 %vm2047_vm0, %v2046_v1 }
 0xe6d   :  { %1932 = vmatprep.subr.bf16.mxu1 %v2046_v1 }
 0xe6f   :  { %1927 = vmatpush3.bf16.msra.mxu0 %v2191_v21 }
 0xe70   :  { %1940 = vmatprep.subr.bf16.mxu0 %v2046_v1 }
 0xf26   :  { %v1303_v24 = vpop.f32.mrf.mxu1 }
 0xf27   :  { %v1304_v25 = vadd.f32 %v1303_v24, %v2250_v0 }
 0xf28   :  { %v1906_v26 = vpop.f32.mrf.mxu1 }
 0xf29   :  { %2000 = vtanh.f32 %v1304_v25 }
 0xf2a   :  { %v1306_v27 = vpop.f32.mrf.mxu1  ;;  %v1350_v46 = vpop.f32.mrf.mxu0 }
 0xf2b   :  { %v1351_v29 = vadd.f32 %v1350_v46, %v2238_v49 }
 0xf2c   :  { %v1907_v4 = vpop.f32.mrf.mxu1  ;;  %v1914_v31 = vpop.f32.mrf.mxu0 }
 0xf2d   :  { %2002 = vtanh.f32 %v1351_v29 }
 0xf2e   :  { %v1353_v33 = vpop.f32.mrf.mxu0 }
 0xf30   :  { %v1915_v34 = vpop.f32.mrf.mxu0 }
 0xf36   :  { %v2001_v36 = vpop.eup %2000 }
 0xf37   :  { %v1357_v38 = vmul.f32 0.5, %v2001_v36 }
 0xf39   :  { %v1358_v39 = vadd.f32 0.5, %v1357_v38 }
 0xf3a   :  { %v2003_v41 = vpop.eup %2002 }
 0xf3b   :  { %v1359_v40 = vsel %vm2262_vm6, %v2001_v36, %v1358_v39  ;;  %v1378_v42 = vmul.f32 0.5, %v2003_v41 }
 0xf3c   :  { %1362 = vrot.lane.b32.xlu0 %v1359_v40, %s2049_s3  ;;  %v1360_v47 = vmul.f32 %v1359_v40, %v1232_v5 }
 0xf3d   :  { %v1379_v0 = vadd.f32 0.5, %v1378_v42 }
 0xf3f   :  { %v1380_v10 = vsel %vm2262_vm6, %v2003_v41, %v1379_v0 }
 0xf40   :  { %1383 = vrot.lane.b32.xlu1 %v1380_v10, %s2049_s3  ;;  %v1381_v37 = vmul.f32 %v1380_v10, %v1253_v9 }
 0xfae   :  { %v1363_v49 = vpop.permute.xlu0 %1362 }
 0xfaf   :  { %v1365_v44 = vmul.f32 %v1363_v49, %v1359_v40 }
 0xfb1   :  { %1367 = vrot.lane.b32.xlu0 %v1365_v44, %s2050_s4 }
 0xfb2   :  { %v1384_v28 = vpop.permute.xlu1 %1383 }
 0xfb3   :  { %v1386_v45 = vmul.f32 %v1384_v28, %v1380_v10 }
 0xfb5   :  { %1388 = vrot.lane.b32.xlu1 %v1386_v45, %s2050_s4 }
0x1023   :  { %v1368_v30 = vpop.permute.xlu0 %1367 }
0x1024   :  { %v1370_v23 = vadd.f32 %v1368_v30, %v1360_v47 }
0x1026   :  { %2004 = vtanh.f32 %v1370_v23 }
0x1027   :  { %v1389_v50 = vpop.permute.xlu1 %1388 }
0x1028   :  { %v1391_v51 = vadd.f32 %v1389_v50, %v1381_v37 }
0x102a   :  { %2006 = vtanh.f32 %v1391_v51 }
0x1033   :  { %v2005_v53 = vpop.eup %2004 }
0x1034   :  { %1373 = vrot.lane.b32.xlu0 %v2005_v53, %s2049_s3 }
0x1037   :  { %v2007_v54 = vpop.eup %2006 }
0x1038   :  { %1394 = vrot.lane.b32.xlu1 %v2007_v54, %s2049_s3 }
0x10a6   :  { %v1374_v56 = vpop.permute.xlu0 %1373 }
0x10a7   :  { %v1376_v57 = vmul.f32 %v1374_v56, %v1359_v40 }
0x10a9   :  { %v1400_v58 = vpack.c.bf16 %v1376_v57, %v1376_v57 }
0x10aa   :  { %v1395_v60 = vpop.permute.xlu1 %1394 }
0x10ab   :  { %v1397_v55 = vmul.f32 %v1395_v60, %v1380_v10  ;;  %1402 = vrot.lane.b32.xlu0 %v1400_v58, %s2050_s4 }
0x10ad   :  { %v1447_v62 = vpack.c.bf16 %v1397_v55, %v1397_v55 }
0x10af   :  { %1449 = vrot.lane.b32.xlu1 %v1447_v62, %s2050_s4 }
0x111d   :  { %v1403_v2 = vpop.permute.xlu0 %1402 }
0x111e   :  { %1921 = vmatmul.mubr.msk.bf16.vlgmr.msra.gmra.mxu1 %vm43_vm2, %v1403_v2 }
0x111f   :  { %1933 = vmatpush3.bf16.msra.mxu1 %v2169_v18  ;;  %1936 = vmatprep.mubr.msk.bf16.mxu1 %vm2047_vm0, %v2046_v1 }
0x1120   :  { %1934 = vmatprep.subr.bf16.mxu1 %v2046_v1 }
0x1121   :  { %v1450_v59 = vpop.permute.xlu1 %1449 }
0x1122   :  { %1929 = vmatmul.mubr.msk.bf16.vlgmr.msra.gmra.mxu0 %vm43_vm2, %v1450_v59 }
0x1123   :  { %1941 = vmatpush3.bf16.msra.mxu0 %v2183_v20  ;;  %1935 = vmatpush3.bf16.msra.mxu1 %v2208_v22 }
0x1124   :  { %1942 = vmatprep.subr.bf16.mxu0 %v2046_v1  ;;  %1944 = vmatprep.mubr.msk.bf16.mxu0 %vm2047_vm0, %v2046_v1 }
0x1127   :  { %1943 = vmatpush3.bf16.msra.mxu0 %v2191_v21 }
0x11de   :  { %v1441_v18 = vpop.f32.mrf.mxu1 }
0x11df   :  { %v1442_v63 = vadd.f32 %v1441_v18, %v2254_v7 }
0x11e0   :  { %v1922_v3 = vpop.f32.mrf.mxu1 }
0x11e1   :  { %2008 = vtanh.f32 %v1442_v63 }
0x11e2   :  { %v1444_v5 = vpop.f32.mrf.mxu1  ;;  %v1488_v6 = vpop.f32.mrf.mxu0 }
0x11e3   :  { %v1489_v8 = vadd.f32 %v1488_v6, %v2233_v43 }
0x11e4   :  { %v1923_v9 = vpop.f32.mrf.mxu1  ;;  %v1930_v20 = vpop.f32.mrf.mxu0 }
0x11e5   :  { %2010 = vtanh.f32 %v1489_v8 }
0x11e6   :  { %v1491_v22 = vpop.f32.mrf.mxu0 }
0x11e8   :  { %v1931_v11 = vpop.f32.mrf.mxu0 }
0x11ee   :  { %v2009_v32 = vpop.eup %2008 }
0x11ef   :  { %v1495_v52 = vmul.f32 0.5, %v2009_v32 }
0x11f1   :  { %v1496_v12 = vadd.f32 0.5, %v1495_v52 }
0x11f2   :  { %v2011_v1 = vpop.eup %2010 }
0x11f3   :  { %v1497_v21 = vsel %vm2262_vm6, %v2009_v32, %v1496_v12  ;;  %v1516_v61 = vmul.f32 0.5, %v2011_v1 }
0x11f4   :  { %1500 = vrot.lane.b32.xlu0 %v1497_v21, %s2049_s3  ;;  %v1498_v19 = vmul.f32 %v1497_v21, %v1370_v23 }
0x11f5   :  { %v1517_v7 = vadd.f32 0.5, %v1516_v61 }
0x11f7   :  { %v1518_v14 = vsel %vm2262_vm6, %v2011_v1, %v1517_v7 }
0x11f8   :  { %1521 = vrot.lane.b32.xlu1 %v1518_v14, %s2049_s3  ;;  %v1519_v26 = vmul.f32 %v1518_v14, %v1391_v51 }
0x1266   :  { %v1501_v43 = vpop.permute.xlu0 %1500 }
0x1267   :  { %v1503_v15 = vmul.f32 %v1501_v43, %v1497_v21 }
0x1269   :  { %1505 = vrot.lane.b32.xlu0 %v1503_v15, %s2050_s4 }
0x126a   :  { %v1522_v16 = vpop.permute.xlu1 %1521 }
0x126b   :  { %v1524_v17 = vmul.f32 %v1522_v16, %v1518_v14 }
0x126d   :  { %1526 = vrot.lane.b32.xlu1 %v1524_v17, %s2050_s4 }
0x12db   :  { %v1506_v24 = vpop.permute.xlu0 %1505 }
0x12dc   :  { %v1508_v25 = vadd.f32 %v1506_v24, %v1498_v19 }
0x12de   :  { %2012 = vtanh.f32 %v1508_v25 }
0x12df   :  { %v1527_v27 = vpop.permute.xlu1 %1526 }
0x12e0   :  { %v1529_v46 = vadd.f32 %v1527_v27, %v1519_v26 }
0x12e2   :  { %2014 = vtanh.f32 %v1529_v46 }
0x12eb   :  { %v2013_v29 = vpop.eup %2012 }
0x12ec   :  { %1511 = vrot.lane.b32.xlu0 %v2013_v29, %s2049_s3 }
0x12ef   :  { %v2015_v4 = vpop.eup %2014 }
0x12f0   :  { %1532 = vrot.lane.b32.xlu1 %v2015_v4, %s2049_s3 }
0x135e   :  { %v1512_v31 = vpop.permute.xlu0 %1511 }
0x135f   :  { %v1514_v33 = vmul.f32 %v1512_v31, %v1497_v21 }
0x1361   :  { %v1538_v34 = vpack.c.bf16 %v1514_v33, %v1514_v33 }
0x1362   :  { %v1533_v36 = vpop.permute.xlu1 %1532 }
0x1363   :  { %v1535_v38 = vmul.f32 %v1533_v36, %v1518_v14  ;;  %1540 = vrot.lane.b32.xlu0 %v1538_v34, %s2050_s4 }
0x1365   :  { %v1585_v39 = vpack.c.bf16 %v1535_v38, %v1535_v38 }
0x1367   :  { %1587 = vrot.lane.b32.xlu1 %v1585_v39, %s2050_s4 }
0x13d5   :  { %v1541_v41 = vpop.permute.xlu0 %1540 }
0x13d6   :  { %1937 = vmatmul.mubr.msk.bf16.vlgmr.msra.gmra.mxu1 %vm43_vm2, %v1541_v41 }
0x13d9   :  { %v1588_v40 = vpop.permute.xlu1 %1587 }
0x13da   :  { %1945 = vmatmul.mubr.msk.bf16.vlgmr.msra.gmra.mxu0 %vm43_vm2, %v1588_v40 }
0x1496   :  { %v1579_v42 = vpop.f32.mrf.mxu1 }
0x1497   :  { %v1580_v0 = vadd.f32 %v1579_v42, %v2258_v13 }
0x1498   :  { %v1938_v10 = vpop.f32.mrf.mxu1 }
0x1499   :  { %2016 = vtanh.f32 %v1580_v0 }
0x149a   :  { %v1582_v49 = vpop.f32.mrf.mxu1  ;;  %v1626_v44 = vpop.f32.mrf.mxu0 }
0x149b   :  { %v1627_v28 = vadd.f32 %v1626_v44, %v2223_v35 }
0x149c   :  { %v1939_v45 = vpop.f32.mrf.mxu1  ;;  %v1946_v47 = vpop.f32.mrf.mxu0 }
0x149d   :  { %2018 = vtanh.f32 %v1627_v28 }
0x149e   :  { %v1629_v30 = vpop.f32.mrf.mxu0 }
0x14a0   :  { %v1947_v23 = vpop.f32.mrf.mxu0 }
0x14a6   :  { %v2017_v37 = vpop.eup %2016 }
0x14a7   :  { %v1633_v50 = vmul.f32 0.5, %v2017_v37 }
0x14a9   :  { %v1634_v51 = vadd.f32 0.5, %v1633_v50 }
0x14aa   :  { %v2019_v53 = vpop.eup %2018 }
0x14ab   :  { %v1635_v54 = vsel %vm2262_vm6, %v2017_v37, %v1634_v51  ;;  %v1654_v56 = vmul.f32 0.5, %v2019_v53 }
0x14ac   :  { %1638 = vrot.lane.b32.xlu0 %v1635_v54, %s2049_s3  ;;  %v1636_v62 = vmul.f32 %v1635_v54, %v1508_v25 }
0x14ad   :  { %v1655_v13 = vadd.f32 0.5, %v1654_v56 }
0x14af   :  { %v1656_v57 = vsel %vm2262_vm6, %v2019_v53, %v1655_v13 }
0x14b0   :  { %1659 = vrot.lane.b32.xlu1 %v1656_v57, %s2049_s3  ;;  %v1657_v18 = vmul.f32 %v1656_v57, %v1529_v46 }
0x151e   :  { %v1639_v35 = vpop.permute.xlu0 %1638 }
0x151f   :  { %v1641_v58 = vmul.f32 %v1639_v35, %v1635_v54 }
0x1521   :  { %1643 = vrot.lane.b32.xlu0 %v1641_v58, %s2050_s4 }
0x1522   :  { %v1660_v60 = vpop.permute.xlu1 %1659 }
0x1523   :  { %v1662_v55 = vmul.f32 %v1660_v60, %v1656_v57 }
0x1525   :  { %1664 = vrot.lane.b32.xlu1 %v1662_v55, %s2050_s4 }
0x1593   :  { %v1644_v2 = vpop.permute.xlu0 %1643 }
0x1594   :  { %v1646_v59 = vadd.f32 %v1644_v2, %v1636_v62 }
0x1596   :  { %2020 = vtanh.f32 %v1646_v59 }
0x1597   :  { %v1665_v63 = vpop.permute.xlu1 %1664 }
0x1598   :  { %v1667_v3 = vadd.f32 %v1665_v63, %v1657_v18 }
0x159a   :  { %2022 = vtanh.f32 %v1667_v3 }
0x15a3   :  { %v2021_v48 = vpop.eup %2020 }
0x15a4   :  { %1649 = vrot.lane.b32.xlu0 %v2021_v48, %s2049_s3 }
0x15a7   :  { %v2023_v5 = vpop.eup %2022 }
0x15a8   :  { %1670 = vrot.lane.b32.xlu1 %v2023_v5, %s2049_s3 }
0x1616   :  { %v1650_v6 = vpop.permute.xlu0 %1649 }
0x1617   :  { %v1652_v8 = vmul.f32 %v1650_v6, %v1635_v54 }
0x1619   :  { %1675 = vrot.lane.b32.xlu0 %v1652_v8, %s2050_s4 }
0x161a   :  { %v1671_v9 = vpop.permute.xlu1 %1670 }
0x161b   :  { %v1673_v20 = vmul.f32 %v1671_v9, %v1656_v57 }
0x161d   :  { %1679 = vrot.lane.b32.xlu1 %v1673_v20, %s2049_s3  ;;  %1683 = vrot.lane.b32.xlu0 %v1646_v59, %s2050_s4 }
0x1621   :  { %1687 = vrot.lane.b32.xlu1 %v1667_v3, %s2049_s3 }
0x168b   :  { %v1676_v22 = vpop.permute.xlu0 %1675 }
0x168f   :  { %v1680_v11 = vpop.permute.xlu1 %1679  ;;  %v1684_v52 = vpop.permute.xlu0 %1683 }
0x1690   :  { %v1690_v32 = vsel %vm43_vm2, %v1676_v22, %v1680_v11 }
0x1691   :  { %v1692_v12 = vsel %vm1691_vm7, %v1690_v32, %v1684_v52 }
0x1693   :  { %v1688_v1 = vpop.permute.xlu1 %1687 }
0x1694   :  { %v1694_v21 = vsel %vm1693_vm8, %v1692_v12, %v1688_v1 }
0x1695   :  { %1695 = vst [vmem:[#allocation4] sm:$0xff] %v1694_v21 }
0x1696   :  { %2035 = shalt.err (!%p2032_p4)
}
0x1697   :  { %1705 = dma.vmem_to_hbm [thread:$0]  %s1703_s17, 128, %s2475_s8, [#allocation5]  }
0x1698   :  { %2044 = dma.done.wait [#allocation5], 128  }
0x1699   :  { %2045 = vsyncadd [#allocation5], 4294967168 }
0x169a   :  { %1709 = vsyncpa [#allocation5], 1 }

</bundles_post_ra>
